<compile_context>
chip_gen: v6e
topology: v6e:2x2x1
jax: 0.10.0
libtpu: 0.0.40
codegen_flags: <defaults>
</compile_context>

<pallas_src>
import functools

import jax
import jax.numpy as jnp
from jax.experimental import pallas as pl
from jax.experimental.pallas import tpu as pltpu

B16_DIM, BASE_DIM, L32_DIM = 768, 512, 1024          # concat -> 2304 total
HIDDEN, NUM_CLASSES = 256, 2
OUT_PAD = 128                                         # lane-dense output width
TILE_N = 1024                                         # max batch tile


def _round_up(x, m):
    return (x + m - 1) // m * m


def _bf16_eltwise_ok():
    """bf16 VPU/EUP exists on v6e/v7x; v5e and older should stay f32."""
    try:
        kind = jax.devices()[0].device_kind.lower()
    except Exception:
        return False
    return not any(tag in kind for tag in ("v2", "v3", "v4", "v5"))


def _classifier_kernel(pooled_ref, pb16_ref, pbase_ref, pl32_ref,
                       w1a_ref, w1b_ref, w1c_ref, b1_ref,
                       w2_ref, b2_ref, out_ref, *, bf16_eltwise):
    """Backbone stand-in projection -> softmax (deferred norm) -> concat-as-sum
    of partial matmuls -> Linear+ReLU -> padded Linear, all in VMEM."""
    pooled = pooled_ref[...].astype(jnp.bfloat16)          # bf16 MXU operand

    def row_reduce(x, combine):
        # Pre-combine 128-lane column chunks elementwise (VPU), leaving one
        # cross-lane reduce over just 128 lanes (XLU) per statistic.
        d = x.shape[-1]
        acc = x[:, :128]
        for j in range(1, d // 128):
            acc = combine(acc, x[:, j * 128:(j + 1) * 128])
        return acc.astype(jnp.float32)                     # (T, 128)

    def branch(proj_ref, w_ref):
        eltwise_dtype = jnp.bfloat16 if bf16_eltwise else jnp.float32
        # stand-in backbone: pooled @ proj -> branch logits (T, D), bf16 MXU
        logits = jnp.dot(pooled, proj_ref[...],
                         preferred_element_type=jnp.float32).astype(eltwise_dtype)
        m = jnp.max(row_reduce(logits, jnp.maximum), axis=-1, keepdims=True)
        e = jnp.exp(logits - m.astype(logits.dtype))       # unnormalized softmax
        s = jnp.sum(row_reduce(e, jnp.add), axis=-1, keepdims=True)
        inv = pl.reciprocal(s, approx=True)                # EUP slot
        # matmul on unnormalized e (bf16 operands, f32 accumulate); normalize
        # the small (T, 256) partial instead of the (T, D) probabilities.
        part = jnp.dot(e.astype(jnp.bfloat16), w_ref[...],
                       preferred_element_type=jnp.float32)
        return part * inv                                  # (T, HIDDEN)

    # torch.cat((b16, base, l32), dim=1) @ W1 == sum of per-branch partials
    h = (branch(pb16_ref, w1a_ref)
         + branch(pbase_ref, w1b_ref)
         + branch(pl32_ref, w1c_ref)
         + b1_ref[...])                                    # (T, HIDDEN)
    h = jnp.maximum(h, 0.0)                                # nn.ReLU(True)
    # nn.Dropout() == identity at inference time.
    out_ref[...] = (jnp.dot(h, w2_ref[...], preferred_element_type=jnp.float32)
                    + b2_ref[...]).astype(out_ref.dtype)   # (T, OUT_PAD) bf16


@jax.jit
def morph_detection_forward(x, params):
    """x: (N, C, H, W) float32, NCHW like PyTorch.  Returns (scores, None)."""
    n, c = x.shape[0], x.shape[1]

    # --- backbone stand-in pooling (plain-JAX glue; projections fused below) ---
    pooled = jnp.mean(x, axis=(2, 3))                      # (N, C)

    # batch tiling: >=2 grid steps for large N (feeds both v7x TensorCores),
    # tiny tiles for tiny batches; padding only touches the (N, C) pooled input.
    tile_n = min(TILE_N, _round_up(pl.cdiv(n, 2), 8))
    n_pad = _round_up(n, tile_n)
    if n_pad != n:
        pooled = jnp.pad(pooled, ((0, n_pad - n), (0, 0)))
    grid = (n_pad // tile_n,)

    # classifier params: split W1 per branch (concat-as-sum); bf16 MXU operands
    w1 = params["w1"]
    w1a = w1[:B16_DIM].astype(jnp.bfloat16)                          # (768, 256)
    w1b = w1[B16_DIM:B16_DIM + BASE_DIM].astype(jnp.bfloat16)        # (512, 256)
    w1c = w1[B16_DIM + BASE_DIM:].astype(jnp.bfloat16)               # (1024, 256)
    b1 = params["b1"].reshape(1, HIDDEN)
    p_b16 = params["p_b16"].astype(jnp.bfloat16)
    p_base = params["p_base"].astype(jnp.bfloat16)
    p_l32 = params["p_l32"].astype(jnp.bfloat16)
    # zero-pad final layer to 128 lanes for a lane-dense output store
    w2p = jnp.zeros((HIDDEN, OUT_PAD), jnp.float32).at[:, :NUM_CLASSES].set(params["w2"])
    b2p = jnp.zeros((1, OUT_PAD), jnp.float32).at[:, :NUM_CLASSES].set(
        params["b2"].reshape(1, NUM_CLASSES))

    def row_spec(shape):       # tiled over the batch grid axis
        return pl.BlockSpec(shape, lambda i: (i, 0))

    def resident_spec(shape):  # constant block index -> stays resident in VMEM
        return pl.BlockSpec(shape, lambda i: (0, 0))

    kernel = functools.partial(_classifier_kernel, bf16_eltwise=_bf16_eltwise_ok())

    out_padded = pl.pallas_call(
        kernel,
        out_shape=jax.ShapeDtypeStruct((n_pad, OUT_PAD), jnp.bfloat16),
        grid=grid,
        in_specs=[
            row_spec((tile_n, c)),                         # pooled
            resident_spec((c, B16_DIM)),                   # stand-in projections (bf16)
            resident_spec((c, BASE_DIM)),
            resident_spec((c, L32_DIM)),
            resident_spec((B16_DIM, HIDDEN)),              # W1 splits (bf16)
            resident_spec((BASE_DIM, HIDDEN)),
            resident_spec((L32_DIM, HIDDEN)),
            resident_spec((1, HIDDEN)),                    # b1
            resident_spec((HIDDEN, OUT_PAD)),              # padded W2
            resident_spec((1, OUT_PAD)),                   # padded b2
        ],
        out_specs=row_spec((tile_n, OUT_PAD)),
        compiler_params=pltpu.CompilerParams(
            dimension_semantics=("parallel",),             # megacore-shard batch tiles
            vmem_limit_bytes=48 * 1024 * 1024,             # fits v7x's 64 MiB too
        ),
    )(pooled, p_b16, p_base, p_l32, w1a, w1b, w1c, b1, w2p, b2p)

    scores = out_padded[:n, :NUM_CLASSES].astype(jnp.float32)
    return scores, None


if __name__ == "__main__":
    key = jax.random.PRNGKey(0)
    ks = jax.random.split(key, 8)

    N, C, H, W = 2, 3, 16, 16
    x = jax.random.normal(ks[0], (N, C, H, W), jnp.float32)

    params = {
        # backbone stand-in projections (deterministic synthetic init)
        "p_b16": 0.1 * jax.random.normal(ks[1], (C, B16_DIM), jnp.float32),
        "p_base": 0.1 * jax.random.normal(ks[2], (C, BASE_DIM), jnp.float32),
        "p_l32": 0.1 * jax.random.normal(ks[3], (C, L32_DIM), jnp.float32),
        # classifier: Linear(2304, 256) -> ReLU -> Dropout -> Linear(256, 2)
        "w1": 0.02 * jax.random.normal(ks[4], (B16_DIM + BASE_DIM + L32_DIM, HIDDEN), jnp.float32),
        "b1": 0.01 * jax.random.normal(ks[5], (HIDDEN,), jnp.float32),
        "w2": 0.02 * jax.random.normal(ks[6], (HIDDEN, NUM_CLASSES), jnp.float32),
        "b2": 0.01 * jax.random.normal(ks[7], (NUM_CLASSES,), jnp.float32),
    }

    out, aux = morph_detection_forward(x, params)
    out = jax.block_until_ready(out)
    assert aux is None and out.shape == (N, NUM_CLASSES)

    # pure-JAX f32 reference for the same forward pass
    pooled = jnp.mean(x, axis=(2, 3))
    cat = jnp.concatenate(
        [jax.nn.softmax(pooled @ params["p_b16"], axis=1),
         jax.nn.softmax(pooled @ params["p_base"], axis=1),
         jax.nn.softmax(pooled @ params["p_l32"], axis=1)], axis=1)
    ref = jnp.maximum(cat @ params["w1"] + params["b1"], 0.0) @ params["w2"] + params["b2"]
    # tolerance accounts for bf16 MXU operands, bf16 elementwise path (v6e/v7x),
    # approx reciprocal, and the bf16 output writeback
    assert jnp.allclose(out, ref, atol=2e-3, rtol=2e-2), (out, ref)

    print("KERNEL_OK")
</pallas_src>

<mosaic_0001>
module attributes {stable_mosaic.version = 11 : i64} {
  func.func @_classifier_kernel(%arg0: i32, %arg1: memref<8x3xf32, #tpu.memory_space<vmem>>, %arg2: memref<3x768xbf16, #tpu.memory_space<vmem>>, %arg3: memref<3x512xbf16, #tpu.memory_space<vmem>>, %arg4: memref<3x1024xbf16, #tpu.memory_space<vmem>>, %arg5: memref<768x256xbf16, #tpu.memory_space<vmem>>, %arg6: memref<512x256xbf16, #tpu.memory_space<vmem>>, %arg7: memref<1024x256xbf16, #tpu.memory_space<vmem>>, %arg8: memref<1x256xf32, #tpu.memory_space<vmem>>, %arg9: memref<256x128xf32, #tpu.memory_space<vmem>>, %arg10: memref<1x128xf32, #tpu.memory_space<vmem>>, %arg11: memref<8x128xbf16, #tpu.memory_space<vmem>>) attributes {dimension_semantics = [#tpu.dimension_semantics<parallel>], iteration_bounds = array<i64: 1>, scalar_prefetch = 0 : i64, scratch_operands = 0 : i64, tpu.core_type = #tpu.core_type<tc>, window_params = [{transform_indices = @transform_0, window_bounds = array<i64: 8, 3>}, {pipeline_mode = #tpu.pipeline_mode<synchronous>, transform_indices = @transform_1, window_bounds = array<i64: 3, 768>}, {pipeline_mode = #tpu.pipeline_mode<synchronous>, transform_indices = @transform_2, window_bounds = array<i64: 3, 512>}, {pipeline_mode = #tpu.pipeline_mode<synchronous>, transform_indices = @transform_3, window_bounds = array<i64: 3, 1024>}, {pipeline_mode = #tpu.pipeline_mode<synchronous>, transform_indices = @transform_4, window_bounds = array<i64: 768, 256>}, {pipeline_mode = #tpu.pipeline_mode<synchronous>, transform_indices = @transform_5, window_bounds = array<i64: 512, 256>}, {pipeline_mode = #tpu.pipeline_mode<synchronous>, transform_indices = @transform_6, window_bounds = array<i64: 1024, 256>}, {pipeline_mode = #tpu.pipeline_mode<synchronous>, transform_indices = @transform_7, window_bounds = array<i64: 1, 256>}, {pipeline_mode = #tpu.pipeline_mode<synchronous>, transform_indices = @transform_8, window_bounds = array<i64: 256, 128>}, {pipeline_mode = #tpu.pipeline_mode<synchronous>, transform_indices = @transform_9, window_bounds = array<i64: 1, 128>}, {transform_indices = @transform_10, window_bounds = array<i64: 8, 128>}]} {
    %c0 = arith.constant 0 : index
    %c0_0 = arith.constant 0 : index
    %0 = vector.load %arg1[%c0, %c0_0] : memref<8x3xf32, #tpu.memory_space<vmem>>, vector<8x3xf32>
    %1 = arith.truncf %0 : vector<8x3xf32> to vector<8x3xbf16>
    %c0_1 = arith.constant 0 : index
    %c0_2 = arith.constant 0 : index
    %2 = vector.load %arg2[%c0_1, %c0_2] : memref<3x768xbf16, #tpu.memory_space<vmem>>, vector<3x768xbf16>
    %cst = arith.constant dense<0.000000e+00> : vector<8x768xf32>
    %3 = tpu.matmul %1, %2, %cst {dimension_numbers = #tpu.dot_dimension_numbers<[1], [0], [0], [1], [0, 0, 1, 1], [], []>} : vector<8x3xbf16>, vector<3x768xbf16>, vector<8x768xf32> -> vector<8x768xf32>
    %4 = arith.truncf %3 : vector<8x768xf32> to vector<8x768xbf16>
    %5 = vector.extract_strided_slice %4 {offsets = [0, 0], sizes = [8, 128], strides = [1, 1]} : vector<8x768xbf16> to vector<8x128xbf16>
    %6 = vector.extract_strided_slice %4 {offsets = [0, 128], sizes = [8, 128], strides = [1, 1]} : vector<8x768xbf16> to vector<8x128xbf16>
    %7 = arith.maximumf %5, %6 : vector<8x128xbf16>
    %8 = vector.extract_strided_slice %4 {offsets = [0, 256], sizes = [8, 128], strides = [1, 1]} : vector<8x768xbf16> to vector<8x128xbf16>
    %9 = arith.maximumf %7, %8 : vector<8x128xbf16>
    %10 = vector.extract_strided_slice %4 {offsets = [0, 384], sizes = [8, 128], strides = [1, 1]} : vector<8x768xbf16> to vector<8x128xbf16>
    %11 = arith.maximumf %9, %10 : vector<8x128xbf16>
    %12 = vector.extract_strided_slice %4 {offsets = [0, 512], sizes = [8, 128], strides = [1, 1]} : vector<8x768xbf16> to vector<8x128xbf16>
    %13 = arith.maximumf %11, %12 : vector<8x128xbf16>
    %14 = vector.extract_strided_slice %4 {offsets = [0, 640], sizes = [8, 128], strides = [1, 1]} : vector<8x768xbf16> to vector<8x128xbf16>
    %15 = arith.maximumf %13, %14 : vector<8x128xbf16>
    %16 = arith.extf %15 : vector<8x128xbf16> to vector<8x128xf32>
    %cst_3 = arith.constant dense<0xFF800000> : vector<8xf32>
    %17 = vector.multi_reduction <maximumf>, %16, %cst_3 [1] : vector<8x128xf32> to vector<8xf32>
    %18 = vector.shape_cast %17 : vector<8xf32> to vector<8x1xf32>
    %19 = arith.truncf %18 : vector<8x1xf32> to vector<8x1xbf16>
    %20 = vector.broadcast %19 : vector<8x1xbf16> to vector<8x768xbf16>
    %21 = arith.subf %4, %20 : vector<8x768xbf16>
    %22 = math.exp %21 : vector<8x768xbf16>
    %23 = vector.extract_strided_slice %22 {offsets = [0, 0], sizes = [8, 128], strides = [1, 1]} : vector<8x768xbf16> to vector<8x128xbf16>
    %24 = vector.extract_strided_slice %22 {offsets = [0, 128], sizes = [8, 128], strides = [1, 1]} : vector<8x768xbf16> to vector<8x128xbf16>
    %25 = arith.addf %23, %24 : vector<8x128xbf16>
    %26 = vector.extract_strided_slice %22 {offsets = [0, 256], sizes = [8, 128], strides = [1, 1]} : vector<8x768xbf16> to vector<8x128xbf16>
    %27 = arith.addf %25, %26 : vector<8x128xbf16>
    %28 = vector.extract_strided_slice %22 {offsets = [0, 384], sizes = [8, 128], strides = [1, 1]} : vector<8x768xbf16> to vector<8x128xbf16>
    %29 = arith.addf %27, %28 : vector<8x128xbf16>
    %30 = vector.extract_strided_slice %22 {offsets = [0, 512], sizes = [8, 128], strides = [1, 1]} : vector<8x768xbf16> to vector<8x128xbf16>
    %31 = arith.addf %29, %30 : vector<8x128xbf16>
    %32 = vector.extract_strided_slice %22 {offsets = [0, 640], sizes = [8, 128], strides = [1, 1]} : vector<8x768xbf16> to vector<8x128xbf16>
    %33 = arith.addf %31, %32 : vector<8x128xbf16>
    %34 = arith.extf %33 : vector<8x128xbf16> to vector<8x128xf32>
    %cst_4 = arith.constant dense<0.000000e+00> : vector<8xf32>
    %35 = vector.multi_reduction <add>, %34, %cst_4 [1] : vector<8x128xf32> to vector<8xf32>
    %36 = vector.shape_cast %35 : vector<8xf32> to vector<8x1xf32>
    %37 = tpu.reciprocal %36 {approx = true} : vector<8x1xf32> -> vector<8x1xf32>
    %c0_5 = arith.constant 0 : index
    %c0_6 = arith.constant 0 : index
    %38 = vector.load %arg5[%c0_5, %c0_6] : memref<768x256xbf16, #tpu.memory_space<vmem>>, vector<768x256xbf16>
    %cst_7 = arith.constant dense<0.000000e+00> : vector<8x256xf32>
    %39 = tpu.matmul %22, %38, %cst_7 {dimension_numbers = #tpu.dot_dimension_numbers<[1], [0], [0], [1], [0, 0, 1, 1], [], []>} : vector<8x768xbf16>, vector<768x256xbf16>, vector<8x256xf32> -> vector<8x256xf32>
    %40 = vector.broadcast %37 : vector<8x1xf32> to vector<8x256xf32>
    %41 = arith.mulf %39, %40 : vector<8x256xf32>
    %c0_8 = arith.constant 0 : index
    %c0_9 = arith.constant 0 : index
    %42 = vector.load %arg3[%c0_8, %c0_9] : memref<3x512xbf16, #tpu.memory_space<vmem>>, vector<3x512xbf16>
    %cst_10 = arith.constant dense<0.000000e+00> : vector<8x512xf32>
    %43 = tpu.matmul %1, %42, %cst_10 {dimension_numbers = #tpu.dot_dimension_numbers<[1], [0], [0], [1], [0, 0, 1, 1], [], []>} : vector<8x3xbf16>, vector<3x512xbf16>, vector<8x512xf32> -> vector<8x512xf32>
    %44 = arith.truncf %43 : vector<8x512xf32> to vector<8x512xbf16>
    %45 = vector.extract_strided_slice %44 {offsets = [0, 0], sizes = [8, 128], strides = [1, 1]} : vector<8x512xbf16> to vector<8x128xbf16>
    %46 = vector.extract_strided_slice %44 {offsets = [0, 128], sizes = [8, 128], strides = [1, 1]} : vector<8x512xbf16> to vector<8x128xbf16>
    %47 = arith.maximumf %45, %46 : vector<8x128xbf16>
    %48 = vector.extract_strided_slice %44 {offsets = [0, 256], sizes = [8, 128], strides = [1, 1]} : vector<8x512xbf16> to vector<8x128xbf16>
    %49 = arith.maximumf %47, %48 : vector<8x128xbf16>
    %50 = vector.extract_strided_slice %44 {offsets = [0, 384], sizes = [8, 128], strides = [1, 1]} : vector<8x512xbf16> to vector<8x128xbf16>
    %51 = arith.maximumf %49, %50 : vector<8x128xbf16>
    %52 = arith.extf %51 : vector<8x128xbf16> to vector<8x128xf32>
    %cst_11 = arith.constant dense<0xFF800000> : vector<8xf32>
    %53 = vector.multi_reduction <maximumf>, %52, %cst_11 [1] : vector<8x128xf32> to vector<8xf32>
    %54 = vector.shape_cast %53 : vector<8xf32> to vector<8x1xf32>
    %55 = arith.truncf %54 : vector<8x1xf32> to vector<8x1xbf16>
    %56 = vector.broadcast %55 : vector<8x1xbf16> to vector<8x512xbf16>
    %57 = arith.subf %44, %56 : vector<8x512xbf16>
    %58 = math.exp %57 : vector<8x512xbf16>
    %59 = vector.extract_strided_slice %58 {offsets = [0, 0], sizes = [8, 128], strides = [1, 1]} : vector<8x512xbf16> to vector<8x128xbf16>
    %60 = vector.extract_strided_slice %58 {offsets = [0, 128], sizes = [8, 128], strides = [1, 1]} : vector<8x512xbf16> to vector<8x128xbf16>
    %61 = arith.addf %59, %60 : vector<8x128xbf16>
    %62 = vector.extract_strided_slice %58 {offsets = [0, 256], sizes = [8, 128], strides = [1, 1]} : vector<8x512xbf16> to vector<8x128xbf16>
    %63 = arith.addf %61, %62 : vector<8x128xbf16>
    %64 = vector.extract_strided_slice %58 {offsets = [0, 384], sizes = [8, 128], strides = [1, 1]} : vector<8x512xbf16> to vector<8x128xbf16>
    %65 = arith.addf %63, %64 : vector<8x128xbf16>
    %66 = arith.extf %65 : vector<8x128xbf16> to vector<8x128xf32>
    %cst_12 = arith.constant dense<0.000000e+00> : vector<8xf32>
    %67 = vector.multi_reduction <add>, %66, %cst_12 [1] : vector<8x128xf32> to vector<8xf32>
    %68 = vector.shape_cast %67 : vector<8xf32> to vector<8x1xf32>
    %69 = tpu.reciprocal %68 {approx = true} : vector<8x1xf32> -> vector<8x1xf32>
    %c0_13 = arith.constant 0 : index
    %c0_14 = arith.constant 0 : index
    %70 = vector.load %arg6[%c0_13, %c0_14] : memref<512x256xbf16, #tpu.memory_space<vmem>>, vector<512x256xbf16>
    %cst_15 = arith.constant dense<0.000000e+00> : vector<8x256xf32>
    %71 = tpu.matmul %58, %70, %cst_15 {dimension_numbers = #tpu.dot_dimension_numbers<[1], [0], [0], [1], [0, 0, 1, 1], [], []>} : vector<8x512xbf16>, vector<512x256xbf16>, vector<8x256xf32> -> vector<8x256xf32>
    %72 = vector.broadcast %69 : vector<8x1xf32> to vector<8x256xf32>
    %73 = arith.mulf %71, %72 : vector<8x256xf32>
    %74 = arith.addf %41, %73 : vector<8x256xf32>
    %c0_16 = arith.constant 0 : index
    %c0_17 = arith.constant 0 : index
    %75 = vector.load %arg4[%c0_16, %c0_17] : memref<3x1024xbf16, #tpu.memory_space<vmem>>, vector<3x1024xbf16>
    %cst_18 = arith.constant dense<0.000000e+00> : vector<8x1024xf32>
    %76 = tpu.matmul %1, %75, %cst_18 {dimension_numbers = #tpu.dot_dimension_numbers<[1], [0], [0], [1], [0, 0, 1, 1], [], []>} : vector<8x3xbf16>, vector<3x1024xbf16>, vector<8x1024xf32> -> vector<8x1024xf32>
    %77 = arith.truncf %76 : vector<8x1024xf32> to vector<8x1024xbf16>
    %78 = vector.extract_strided_slice %77 {offsets = [0, 0], sizes = [8, 128], strides = [1, 1]} : vector<8x1024xbf16> to vector<8x128xbf16>
    %79 = vector.extract_strided_slice %77 {offsets = [0, 128], sizes = [8, 128], strides = [1, 1]} : vector<8x1024xbf16> to vector<8x128xbf16>
    %80 = arith.maximumf %78, %79 : vector<8x128xbf16>
    %81 = vector.extract_strided_slice %77 {offsets = [0, 256], sizes = [8, 128], strides = [1, 1]} : vector<8x1024xbf16> to vector<8x128xbf16>
    %82 = arith.maximumf %80, %81 : vector<8x128xbf16>
    %83 = vector.extract_strided_slice %77 {offsets = [0, 384], sizes = [8, 128], strides = [1, 1]} : vector<8x1024xbf16> to vector<8x128xbf16>
    %84 = arith.maximumf %82, %83 : vector<8x128xbf16>
    %85 = vector.extract_strided_slice %77 {offsets = [0, 512], sizes = [8, 128], strides = [1, 1]} : vector<8x1024xbf16> to vector<8x128xbf16>
    %86 = arith.maximumf %84, %85 : vector<8x128xbf16>
    %87 = vector.extract_strided_slice %77 {offsets = [0, 640], sizes = [8, 128], strides = [1, 1]} : vector<8x1024xbf16> to vector<8x128xbf16>
    %88 = arith.maximumf %86, %87 : vector<8x128xbf16>
    %89 = vector.extract_strided_slice %77 {offsets = [0, 768], sizes = [8, 128], strides = [1, 1]} : vector<8x1024xbf16> to vector<8x128xbf16>
    %90 = arith.maximumf %88, %89 : vector<8x128xbf16>
    %91 = vector.extract_strided_slice %77 {offsets = [0, 896], sizes = [8, 128], strides = [1, 1]} : vector<8x1024xbf16> to vector<8x128xbf16>
    %92 = arith.maximumf %90, %91 : vector<8x128xbf16>
    %93 = arith.extf %92 : vector<8x128xbf16> to vector<8x128xf32>
    %cst_19 = arith.constant dense<0xFF800000> : vector<8xf32>
    %94 = vector.multi_reduction <maximumf>, %93, %cst_19 [1] : vector<8x128xf32> to vector<8xf32>
    %95 = vector.shape_cast %94 : vector<8xf32> to vector<8x1xf32>
    %96 = arith.truncf %95 : vector<8x1xf32> to vector<8x1xbf16>
    %97 = vector.broadcast %96 : vector<8x1xbf16> to vector<8x1024xbf16>
    %98 = arith.subf %77, %97 : vector<8x1024xbf16>
    %99 = math.exp %98 : vector<8x1024xbf16>
    %100 = vector.extract_strided_slice %99 {offsets = [0, 0], sizes = [8, 128], strides = [1, 1]} : vector<8x1024xbf16> to vector<8x128xbf16>
    %101 = vector.extract_strided_slice %99 {offsets = [0, 128], sizes = [8, 128], strides = [1, 1]} : vector<8x1024xbf16> to vector<8x128xbf16>
    %102 = arith.addf %100, %101 : vector<8x128xbf16>
    %103 = vector.extract_strided_slice %99 {offsets = [0, 256], sizes = [8, 128], strides = [1, 1]} : vector<8x1024xbf16> to vector<8x128xbf16>
    %104 = arith.addf %102, %103 : vector<8x128xbf16>
    %105 = vector.extract_strided_slice %99 {offsets = [0, 384], sizes = [8, 128], strides = [1, 1]} : vector<8x1024xbf16> to vector<8x128xbf16>
    %106 = arith.addf %104, %105 : vector<8x128xbf16>
    %107 = vector.extract_strided_slice %99 {offsets = [0, 512], sizes = [8, 128], strides = [1, 1]} : vector<8x1024xbf16> to vector<8x128xbf16>
    %108 = arith.addf %106, %107 : vector<8x128xbf16>
    %109 = vector.extract_strided_slice %99 {offsets = [0, 640], sizes = [8, 128], strides = [1, 1]} : vector<8x1024xbf16> to vector<8x128xbf16>
    %110 = arith.addf %108, %109 : vector<8x128xbf16>
    %111 = vector.extract_strided_slice %99 {offsets = [0, 768], sizes = [8, 128], strides = [1, 1]} : vector<8x1024xbf16> to vector<8x128xbf16>
    %112 = arith.addf %110, %111 : vector<8x128xbf16>
    %113 = vector.extract_strided_slice %99 {offsets = [0, 896], sizes = [8, 128], strides = [1, 1]} : vector<8x1024xbf16> to vector<8x128xbf16>
    %114 = arith.addf %112, %113 : vector<8x128xbf16>
    %115 = arith.extf %114 : vector<8x128xbf16> to vector<8x128xf32>
    %cst_20 = arith.constant dense<0.000000e+00> : vector<8xf32>
    %116 = vector.multi_reduction <add>, %115, %cst_20 [1] : vector<8x128xf32> to vector<8xf32>
    %117 = vector.shape_cast %116 : vector<8xf32> to vector<8x1xf32>
    %118 = tpu.reciprocal %117 {approx = true} : vector<8x1xf32> -> vector<8x1xf32>
    %c0_21 = arith.constant 0 : index
    %c0_22 = arith.constant 0 : index
    %119 = vector.load %arg7[%c0_21, %c0_22] : memref<1024x256xbf16, #tpu.memory_space<vmem>>, vector<1024x256xbf16>
    %cst_23 = arith.constant dense<0.000000e+00> : vector<8x256xf32>
    %120 = tpu.matmul %99, %119, %cst_23 {dimension_numbers = #tpu.dot_dimension_numbers<[1], [0], [0], [1], [0, 0, 1, 1], [], []>} : vector<8x1024xbf16>, vector<1024x256xbf16>, vector<8x256xf32> -> vector<8x256xf32>
    %121 = vector.broadcast %118 : vector<8x1xf32> to vector<8x256xf32>
    %122 = arith.mulf %120, %121 : vector<8x256xf32>
    %123 = arith.addf %74, %122 : vector<8x256xf32>
    %c0_24 = arith.constant 0 : index
    %c0_25 = arith.constant 0 : index
    %124 = vector.load %arg8[%c0_24, %c0_25] : memref<1x256xf32, #tpu.memory_space<vmem>>, vector<1x256xf32>
    %125 = vector.broadcast %124 : vector<1x256xf32> to vector<8x256xf32>
    %126 = arith.addf %123, %125 : vector<8x256xf32>
    %cst_26 = arith.constant 0.000000e+00 : f32
    %127 = vector.broadcast %cst_26 : f32 to vector<8x256xf32>
    %128 = arith.maximumf %126, %127 : vector<8x256xf32>
    %c0_27 = arith.constant 0 : index
    %c0_28 = arith.constant 0 : index
    %129 = vector.load %arg9[%c0_27, %c0_28] : memref<256x128xf32, #tpu.memory_space<vmem>>, vector<256x128xf32>
    %cst_29 = arith.constant dense<0.000000e+00> : vector<8x128xf32>
    %130 = tpu.matmul %128, %129, %cst_29 {dimension_numbers = #tpu.dot_dimension_numbers<[1], [0], [0], [1], [0, 0, 1, 1], [], []>} : vector<8x256xf32>, vector<256x128xf32>, vector<8x128xf32> -> vector<8x128xf32>
    %c0_30 = arith.constant 0 : index
    %c0_31 = arith.constant 0 : index
    %131 = vector.load %arg10[%c0_30, %c0_31] : memref<1x128xf32, #tpu.memory_space<vmem>>, vector<1x128xf32>
    %132 = vector.broadcast %131 : vector<1x128xf32> to vector<8x128xf32>
    %133 = arith.addf %130, %132 : vector<8x128xf32>
    %134 = arith.truncf %133 : vector<8x128xf32> to vector<8x128xbf16>
    %c0_32 = arith.constant 0 : index
    %c0_33 = arith.constant 0 : index
    %135 = vector.load %arg11[%c0_32, %c0_33] : memref<8x128xbf16, #tpu.memory_space<vmem>>, vector<8x128xbf16>
    tpu.vector_store %arg11[%c0_32, %c0_33], %134 {strides = array<i32>} : memref<8x128xbf16, #tpu.memory_space<vmem>>, vector<8x128xbf16>,
    return
  }
  func.func @transform_0(%arg0: i32) -> (i32, i32) {
    %c0_i32 = arith.constant 0 : i32
    %c0_i32_0 = arith.constant 0 : i32
    return %arg0, %c0_i32 : i32, i32
  }
  func.func @transform_1(%arg0: i32) -> (i32, i32) {
    %c0_i32 = arith.constant 0 : i32
    %c0_i32_0 = arith.constant 0 : i32
    %c0_i32_1 = arith.constant 0 : i32
    return %c0_i32, %c0_i32_0 : i32, i32
  }
  func.func @transform_2(%arg0: i32) -> (i32, i32) {
    %c0_i32 = arith.constant 0 : i32
    %c0_i32_0 = arith.constant 0 : i32
    %c0_i32_1 = arith.constant 0 : i32
    return %c0_i32, %c0_i32_0 : i32, i32
  }
  func.func @transform_3(%arg0: i32) -> (i32, i32) {
    %c0_i32 = arith.constant 0 : i32
    %c0_i32_0 = arith.constant 0 : i32
    %c0_i32_1 = arith.constant 0 : i32
    return %c0_i32, %c0_i32_0 : i32, i32
  }
  func.func @transform_4(%arg0: i32) -> (i32, i32) {
    %c0_i32 = arith.constant 0 : i32
    %c0_i32_0 = arith.constant 0 : i32
    %c0_i32_1 = arith.constant 0 : i32
    return %c0_i32, %c0_i32_0 : i32, i32
  }
  func.func @transform_5(%arg0: i32) -> (i32, i32) {
    %c0_i32 = arith.constant 0 : i32
    %c0_i32_0 = arith.constant 0 : i32
    %c0_i32_1 = arith.constant 0 : i32
    return %c0_i32, %c0_i32_0 : i32, i32
  }
  func.func @transform_6(%arg0: i32) -> (i32, i32) {
    %c0_i32 = arith.constant 0 : i32
    %c0_i32_0 = arith.constant 0 : i32
    %c0_i32_1 = arith.constant 0 : i32
    return %c0_i32, %c0_i32_0 : i32, i32
  }
  func.func @transform_7(%arg0: i32) -> (i32, i32) {
    %c0_i32 = arith.constant 0 : i32
    %c0_i32_0 = arith.constant 0 : i32
    %c0_i32_1 = arith.constant 0 : i32
    return %c0_i32, %c0_i32_0 : i32, i32
  }
  func.func @transform_8(%arg0: i32) -> (i32, i32) {
    %c0_i32 = arith.constant 0 : i32
    %c0_i32_0 = arith.constant 0 : i32
    %c0_i32_1 = arith.constant 0 : i32
    return %c0_i32, %c0_i32_0 : i32, i32
  }
  func.func @transform_9(%arg0: i32) -> (i32, i32) {
    %c0_i32 = arith.constant 0 : i32
    %c0_i32_0 = arith.constant 0 : i32
    %c0_i32_1 = arith.constant 0 : i32
    return %c0_i32, %c0_i32_0 : i32, i32
  }
  func.func @transform_10(%arg0: i32) -> (i32, i32) {
    %c0_i32 = arith.constant 0 : i32
    %c0_i32_0 = arith.constant 0 : i32
    return %arg0, %c0_i32 : i32, i32
  }
}

</mosaic_0001>

<bundles_post_ra>
// kernel: morph_detection_forward.1
= control target key start
LH: loop header
LB: loop body
LE: loop exit
PB: predicated region body
PF: predicated region fallthrough
CT: control target
= control target key end

     0   :  { %v46_v0 = vlaneseq  ;;  %vm71_vm0 = vcmask 1040384   ;;  %vm72_vm1 = vcmask 1041408   ;;  %v3752_v2 = vmov 1983009808   ;;  %s4979_s1 = inlined_call_operand.vmem [shape: bf16[3,768], index: 1, kind: input, shape index: {}]   ;;  %s4980_s0 = inlined_call_operand.vmem [shape: f32[8,3], index: 0, kind: input, shape index: {}]   ;;  %s4981_s4 = inlined_call_operand.vmem [shape: bf16[768,256], index: 4, kind: input, shape index: {}]   ;;  %s4982_s2 = inlined_call_operand.vmem [shape: bf16[3,512], index: 2, kind: input, shape index: {}]   ;;  %s4983_s5 = inlined_call_operand.vmem [shape: bf16[512,256], index: 5, kind: input, shape index: {}]   ;;  %s4984_s3 = inlined_call_operand.vmem [shape: bf16[3,1024], index: 3, kind: input, shape index: {}]   ;;  %s4985_s6 = inlined_call_operand.vmem [shape: bf16[1024,256], index: 6, kind: input, shape index: {}]   ;;  %s4986_s8 = inlined_call_operand.vmem [shape: f32[256,128], index: 8, kind: input, shape index: {}]   ;;  %s4987_s7 = inlined_call_operand.vmem [shape: f32[1,256], index: 7, kind: input, shape index: {}]   ;;  %s4988_s9 = inlined_call_operand.vmem [shape: f32[1,128], index: 9, kind: input, shape index: {}]   ;;  %s4989_s10 = inlined_call_operand.vmem [shape: bf16[8,128], index: 10, kind: output, shape index: {}]  }
   0x1   :  { %v38_v1 = vld [vmem:[%s4979_s1] sm:$0xff]  ;;  %v44_v3 = vunpack.c.l.s4 %v3752_v2  ;;  %v3753_v5 = vmov 65535   ;;  %v3754_v7 = vmov 0   ;;  %vm67_vm2 = vcmask 23552   ;;  %v3275_v26 = vld [vmem:[%s4981_s4 + $0x70] ss:$8 sps:$4 sm:$0xff]  }
   0x2   :  { %v3813_v4 = vshrl.u32 %v46_v0, 7  ;;  %v73_v6 = vsel %vm71_vm0, 4294967295, %v3753_v5  ;;  %125 = vmatprep.mubr.bf16.mxu1 %v3754_v7  ;;  %v2937_v8 = vld.sshfl [vmem:[%s4979_s1 + $0x8] sm:$0x33 pattern:$0x76325410]  ;;  %207 = vmatprep.mubr.bf16.mxu0 %v3754_v7  ;;  %v42_v9 = vcombine.high %v38_v1, %v38_v1 }
   0x3   :  { %v45_v10 = vunpack.c.0.s8 %v44_v3  ;;  %v3820_v11 = vsel %vm72_vm1, %v73_v6, 0  ;;  %v66_v12 = vcombine.high %v2937_v8, %v2937_v8  ;;  %v36_v16 = vld [vmem:[%s4980_s0] sm:$0xff]  ;;  %v3277_v27 = vld [vmem:[%s4981_s4 + $0x74] ss:$8 sps:$4 sm:$0xff]   ;;  %v3278_v28 = vld [vmem:[%s4981_s4 + $0x170] ss:$8 sps:$4 sm:$0xff]  }
   0x4   :  { %v88_v13 = vand.u32 %v2937_v8, %v3820_v11  ;;  %v3832_v20 = vpack.c.bf16 %v36_v16, %v36_v16  ;;  %v3280_v29 = vld [vmem:[%s4981_s4 + $0x174] ss:$8 sps:$4 sm:$0xff]   ;;  %v3281_v30 = vld [vmem:[%s4981_s4 + $0x60] ss:$8 sps:$4 sm:$0xff]   ;;  %v3283_v31 = vld [vmem:[%s4981_s4 + $0x64] ss:$8 sps:$4 sm:$0xff]  }
   0x5   :  { %v3824_v14 = vsub.s32 %v45_v10, %v3813_v4  ;;  %v91_v15 = vand.u32 %v3820_v11, %v66_v12  ;;  %v3284_v32 = vld [vmem:[%s4981_s4 + $0x160] ss:$8 sps:$4 sm:$0xff]   ;;  %v3286_v33 = vld [vmem:[%s4981_s4 + $0x164] ss:$8 sps:$4 sm:$0xff]   ;;  %v3289_v34 = vld [vmem:[%s4981_s4 + $0x54] ss:$8 sps:$4 sm:$0xff]  }
   0x6   :  { %v3287_v35 = vld [vmem:[%s4981_s4 + $0x50] ss:$8 sps:$4 sm:$0xff]   ;;  %v3292_v36 = vld [vmem:[%s4981_s4 + $0x154] ss:$8 sps:$4 sm:$0xff]   ;;  %v3295_v38 = vld [vmem:[%s4981_s4 + $0x44] ss:$8 sps:$4 sm:$0xff]  }
   0x7   :  { %v49_v17 = vrot.slane %v38_v1, %v3824_v14  ;;  %v56_v18 = vrot.slane %v42_v9, %v3824_v14  ;;  %189 = vmatprep.subr.bf16.mxu0 %v91_v15  ;;  %v3290_v37 = vld [vmem:[%s4981_s4 + $0x150] ss:$8 sps:$4 sm:$0xff]   ;;  %v3298_v39 = vld [vmem:[%s4981_s4 + $0x144] ss:$8 sps:$4 sm:$0xff]   ;;  %v3293_v40 = vld [vmem:[%s4981_s4 + $0x40] ss:$8 sps:$4 sm:$0xff]  }
   0x8   :  { %190 = vmatpush1.bf16.msra.mxu0 %v88_v13  ;;  %v3296_v41 = vld [vmem:[%s4981_s4 + $0x140] ss:$8 sps:$4 sm:$0xff]   ;;  %v3301_v42 = vld [vmem:[%s4981_s4 + $0x34] ss:$8 sps:$4 sm:$0xff]   ;;  %v3299_v44 = vld [vmem:[%s4981_s4 + $0x30] ss:$8 sps:$4 sm:$0xff]  }
   0x9   :  { %v57_v19 = vcombine.high %v49_v17, %v49_v17  ;;  %v58_v21 = vcombine.high %v56_v18, %v56_v18  ;;  %v76_v22 = vand.u32 %v3820_v11, %v49_v17  ;;  %v82_v25 = vand.u32 %v3820_v11, %v56_v18  ;;  %881 = vmatprep.subr.bf16.mxu0 %v3280_v29  ;;  %v3304_v43 = vld [vmem:[%s4981_s4 + $0x134] ss:$8 sps:$4 sm:$0xff]   ;;  %v3302_v45 = vld [vmem:[%s4981_s4 + $0x130] ss:$8 sps:$4 sm:$0xff]   ;;  %v3307_v46 = vld [vmem:[%s4981_s4 + $0x24] ss:$8 sps:$4 sm:$0xff]  }
   0xa   :  { %v3310_v47 = vld [vmem:[%s4981_s4 + $0x124] ss:$8 sps:$4 sm:$0xff]   ;;  %v3305_v48 = vld [vmem:[%s4981_s4 + $0x20] ss:$8 sps:$4 sm:$0xff]   ;;  %v3313_v50 = vld [vmem:[%s4981_s4 + $0x14] ss:$8 sps:$4 sm:$0xff]  }
   0xb   :  { %v79_v23 = vand.u32 %v3820_v11, %v57_v19  ;;  %v85_v24 = vand.u32 %v3820_v11, %v58_v21  ;;  %2940 = vmatmul.mubr.msk.bf16.vlgmr.msra.gmra.mxu0 %vm67_vm2, %v3832_v20  ;;  %v3308_v49 = vld [vmem:[%s4981_s4 + $0x120] ss:$8 sps:$4 sm:$0xff]   ;;  %v3316_v51 = vld [vmem:[%s4981_s4 + $0x114] ss:$8 sps:$4 sm:$0xff]   ;;  %v3311_v52 = vld [vmem:[%s4981_s4 + $0x10] ss:$8 sps:$4 sm:$0xff]  }
   0xc   :  { %882 = vmatpush1.bf16.msra.mxu0 %v3278_v28  ;;  %v3314_v53 = vld [vmem:[%s4981_s4 + $0x110] ss:$8 sps:$4 sm:$0xff]   ;;  %v3319_v54 = vld [vmem:[%s4981_s4 + $0x4] ss:$8 sps:$4 sm:$0xff]   ;;  %v3317_v56 = vld [vmem:[%s4981_s4] ss:$8 sps:$4 sm:$0xff]  }
   0xd   :  { %107 = vmatprep.subr.bf16.mxu1 %v79_v23  ;;  %883 = vmatprep.subr.bf16.mxu0 %v3286_v33  ;;  %v3322_v55 = vld [vmem:[%s4981_s4 + $0x104] ss:$8 sps:$4 sm:$0xff]   ;;  %v3320_v57 = vld [vmem:[%s4981_s4 + $0x100] ss:$8 sps:$4 sm:$0xff]   ;;  %v3325_v58 = vld [vmem:[%s4981_s4 + $0xf4] ss:$8 sps:$4 sm:$0xff]  }
   0xe   :  { %108 = vmatpush1.bf16.msra.mxu1 %v76_v22  ;;  %v3328_v59 = vld [vmem:[%s4981_s4 + $0x1f4] ss:$8 sps:$4 sm:$0xff]   ;;  %v3323_v60 = vld [vmem:[%s4981_s4 + $0xf0] ss:$8 sps:$4 sm:$0xff]   ;;  %v3331_v62 = vld [vmem:[%s4981_s4 + $0xe4] ss:$8 sps:$4 sm:$0xff]  }
   0xf   :  { %148 = vmatprep.subr.bf16.mxu1 %v85_v24  ;;  %v3326_v61 = vld [vmem:[%s4981_s4 + $0x1f0] ss:$8 sps:$4 sm:$0xff]   ;;  %v3334_v63 = vld [vmem:[%s4981_s4 + $0x1e4] ss:$8 sps:$4 sm:$0xff]   ;;  %v3329_v0 = vld [vmem:[%s4981_s4 + $0xe0] ss:$8 sps:$4 sm:$0xff]  }
  0x10   :  { %884 = vmatpush1.bf16.msra.mxu0 %v3284_v32  ;;  %v3332_v1 = vld [vmem:[%s4981_s4 + $0x1e0] ss:$8 sps:$4 sm:$0xff]   ;;  %v3337_v2 = vld [vmem:[%s4981_s4 + $0xd4] ss:$8 sps:$4 sm:$0xff]   ;;  %v3335_v5 = vld [vmem:[%s4981_s4 + $0xd0] ss:$8 sps:$4 sm:$0xff]  }
  0x11   :  { %2938 = vmatmul.mubr.msk.bf16.vlgmr.msra.gmra.mxu1 %vm67_vm2, %v3832_v20  ;;  %885 = vmatprep.subr.bf16.mxu0 %v3292_v36  ;;  %v3340_v3 = vld [vmem:[%s4981_s4 + $0x1d4] ss:$8 sps:$4 sm:$0xff]   ;;  %v3338_v6 = vld [vmem:[%s4981_s4 + $0x1d0] ss:$8 sps:$4 sm:$0xff]   ;;  %v3341_v36 = vld [vmem:[%s4981_s4 + $0xc0] ss:$8 sps:$4 sm:$0xff]  }
  0x12   :  { %149 = vmatpush1.bf16.msra.mxu1 %v82_v25  ;;  %166 = vmatprep.mubr.bf16.mxu1 %v3754_v7 }
  0x13   :  { %840 = vmatprep.subr.bf16.mxu1 %v3277_v27 }
  0x14   :  { %886 = vmatpush1.bf16.msra.mxu0 %v3290_v37  ;;  %v3346_v37 = vld [vmem:[%s4981_s4 + $0x1c4] ss:$8 sps:$4 sm:$0xff]  }
  0x15   :  { %887 = vmatprep.subr.bf16.mxu0 %v3298_v39  ;;  %v3349_v39 = vld [vmem:[%s4981_s4 + $0xb4] ss:$8 sps:$4 sm:$0xff]  }
  0x18   :  { %888 = vmatpush1.bf16.msra.mxu0 %v3296_v41  ;;  %v3352_v41 = vld [vmem:[%s4981_s4 + $0x1b4] ss:$8 sps:$4 sm:$0xff]  }
  0x19   :  { %2939 = vmatmul.mubr.msk.bf16.vlgmr.msra.gmra.mxu1 %vm67_vm2, %v3832_v20  ;;  %889 = vmatprep.subr.bf16.mxu0 %v3304_v43  ;;  %v3353_v43 = vld [vmem:[%s4981_s4 + $0xa0] ss:$8 sps:$4 sm:$0xff]  }
  0x1a   :  { %841 = vmatpush1.bf16.msra.mxu1 %v3275_v26 }
  0x1b   :  { %842 = vmatprep.subr.bf16.mxu1 %v3283_v31 }
  0x1c   :  { %890 = vmatpush1.bf16.msra.mxu0 %v3302_v45  ;;  %v3356_v45 = vld [vmem:[%s4981_s4 + $0x1a0] ss:$8 sps:$4 sm:$0xff]  }
  0x1d   :  { %891 = vmatprep.subr.bf16.mxu0 %v3310_v47  ;;  %v3361_v47 = vld [vmem:[%s4981_s4 + $0x94] ss:$8 sps:$4 sm:$0xff]  }
  0x1e   :  { %843 = vmatpush1.bf16.msra.mxu1 %v3281_v30 }
  0x1f   :  { %844 = vmatprep.subr.bf16.mxu1 %v3289_v34 }
  0x20   :  { %892 = vmatpush1.bf16.msra.mxu0 %v3308_v49  ;;  %v3359_v49 = vld [vmem:[%s4981_s4 + $0x90] ss:$8 sps:$4 sm:$0xff]  }
  0x21   :  { %893 = vmatprep.subr.bf16.mxu0 %v3316_v51  ;;  %v3367_v51 = vld [vmem:[%s4981_s4 + $0x84] ss:$8 sps:$4 sm:$0xff]  }
  0x22   :  { %845 = vmatpush1.bf16.msra.mxu1 %v3287_v35  ;;  %v3343_v35 = vld [vmem:[%s4981_s4 + $0xc4] ss:$8 sps:$4 sm:$0xff]  }
  0x23   :  { %846 = vmatprep.subr.bf16.mxu1 %v3295_v38  ;;  %v3344_v38 = vld [vmem:[%s4981_s4 + $0x1c0] ss:$8 sps:$4 sm:$0xff]  }
  0x24   :  { %894 = vmatpush1.bf16.msra.mxu0 %v3314_v53  ;;  %v3365_v53 = vld [vmem:[%s4981_s4 + $0x80] ss:$8 sps:$4 sm:$0xff]  }
  0x25   :  { %895 = vmatprep.subr.bf16.mxu0 %v3322_v55  ;;  %v3373_v55 = vld [vmem:[%s4981_s4 + $0x274] ss:$8 sps:$4 sm:$0xff]  }
  0x26   :  { %847 = vmatpush1.bf16.msra.mxu1 %v3293_v40  ;;  %v3347_v40 = vld [vmem:[%s4981_s4 + $0xb0] ss:$8 sps:$4 sm:$0xff]  }
  0x27   :  { %848 = vmatprep.subr.bf16.mxu1 %v3301_v42  ;;  %v3350_v42 = vld [vmem:[%s4981_s4 + $0x1b0] ss:$8 sps:$4 sm:$0xff]  }
  0x28   :  { %896 = vmatpush1.bf16.msra.mxu0 %v3320_v57 }
  0x29   :  { %897 = vmatprep.subr.bf16.mxu0 %v3328_v59 }
  0x2a   :  { %849 = vmatpush1.bf16.msra.mxu1 %v3299_v44  ;;  %v3355_v44 = vld [vmem:[%s4981_s4 + $0xa4] ss:$8 sps:$4 sm:$0xff]  }
  0x2b   :  { %850 = vmatprep.subr.bf16.mxu1 %v3307_v46  ;;  %v3358_v46 = vld [vmem:[%s4981_s4 + $0x1a4] ss:$8 sps:$4 sm:$0xff]  }
  0x2c   :  { %898 = vmatpush2.bf16.msra.mxu0 %v3326_v61 }
  0x2d   :  { %899 = vmatprep.subr.bf16.mxu0 %v3334_v63 }
  0x2e   :  { %851 = vmatpush1.bf16.msra.mxu1 %v3305_v48  ;;  %v3364_v48 = vld [vmem:[%s4981_s4 + $0x194] ss:$8 sps:$4 sm:$0xff]  }
  0x2f   :  { %852 = vmatprep.subr.bf16.mxu1 %v3313_v50  ;;  %v3362_v50 = vld [vmem:[%s4981_s4 + $0x190] ss:$8 sps:$4 sm:$0xff]  }
  0x30   :  { %900 = vmatpush2.bf16.msra.mxu0 %v3332_v1 }
  0x31   :  { %901 = vmatprep.subr.bf16.mxu0 %v3340_v3 }
  0x32   :  { %853 = vmatpush1.bf16.msra.mxu1 %v3311_v52  ;;  %v3370_v52 = vld [vmem:[%s4981_s4 + $0x184] ss:$8 sps:$4 sm:$0xff]  }
  0x33   :  { %854 = vmatprep.subr.bf16.mxu1 %v3319_v54  ;;  %v3368_v54 = vld [vmem:[%s4981_s4 + $0x180] ss:$8 sps:$4 sm:$0xff]  }
  0x34   :  { %902 = vmatpush2.bf16.msra.mxu0 %v3338_v6 }
  0x35   :  { %903 = vmatprep.subr.bf16.mxu0 %v3346_v37 }
  0x36   :  { %855 = vmatpush1.bf16.msra.mxu1 %v3317_v56  ;;  %v965_v56 = vld [vmem:[%s4982_s2] sm:$0xff] }
  0x37   :  { %856 = vmatprep.subr.bf16.mxu1 %v3325_v58  ;;  %v974_v57 = vrot.slane %v965_v56, %v3824_v14 }
  0x38   :  { %904 = vmatpush2.bf16.msra.mxu0 %v3344_v38  ;;  %v3381_v38 = vld [vmem:[%s4981_s4 + $0x240] ss:$8 sps:$4 sm:$0xff]  }
  0x39   :  { %905 = vmatprep.subr.bf16.mxu0 %v3352_v41  ;;  %v982_v58 = vcombine.high %v974_v57, %v974_v57  ;;  %v3389_v41 = vld [vmem:[%s4981_s4 + $0x224] ss:$8 sps:$4 sm:$0xff]  }
  0x3a   :  { %857 = vmatpush2.bf16.msra.mxu1 %v3323_v60 }
  0x3b   :  { %858 = vmatprep.subr.bf16.mxu1 %v3331_v62  ;;  %v988_v59 = vand.u32 %v982_v58, %v3820_v11  ;;  %v3411_v58 = vld [vmem:[%s4981_s4 + $0x2a0] ss:$8 sps:$4 sm:$0xff]  }
  0x3c   :  { %906 = vmatpush2.bf16.msra.mxu0 %v3350_v42  ;;  %v3387_v42 = vld [vmem:[%s4981_s4 + $0x220] ss:$8 sps:$4 sm:$0xff]  }
  0x3d   :  { %907 = vmatprep.subr.bf16.mxu0 %v3358_v46  ;;  %v3393_v46 = vld [vmem:[%s4981_s4 + $0x200] ss:$8 sps:$4 sm:$0xff]  }
  0x3e   :  { %859 = vmatpush2.bf16.msra.mxu1 %v3329_v0 }
  0x3f   :  { %860 = vmatprep.subr.bf16.mxu1 %v3337_v2 }
  0x40   :  { %908 = vmatpush2.bf16.msra.mxu0 %v3356_v45  ;;  %v3395_v45 = vld [vmem:[%s4981_s4 + $0x204] ss:$8 sps:$4 sm:$0xff]  }
  0x41   :  { %909 = vmatprep.subr.bf16.mxu0 %v3364_v48  ;;  %v3396_v48 = vld [vmem:[%s4981_s4 + $0x2f0] ss:$8 sps:$4 sm:$0xff]  }
  0x42   :  { %861 = vmatpush2.bf16.msra.mxu1 %v3335_v5 }
  0x43   :  { %862 = vmatprep.subr.bf16.mxu1 %v3343_v35  ;;  %v3383_v35 = vld [vmem:[%s4981_s4 + $0x244] ss:$8 sps:$4 sm:$0xff]  }
  0x44   :  { %910 = vmatpush2.bf16.msra.mxu0 %v3362_v50  ;;  %v3399_v50 = vld [vmem:[%s4981_s4 + $0x2e0] ss:$8 sps:$4 sm:$0xff]  }
  0x45   :  { %911 = vmatprep.subr.bf16.mxu0 %v3370_v52  ;;  %v3402_v52 = vld [vmem:[%s4981_s4 + $0x2d0] ss:$8 sps:$4 sm:$0xff]  }
  0x46   :  { %863 = vmatpush2.bf16.msra.mxu1 %v3341_v36 }
  0x47   :  { %864 = vmatprep.subr.bf16.mxu1 %v3349_v39  ;;  %v3386_v39 = vld [vmem:[%s4981_s4 + $0x234] ss:$8 sps:$4 sm:$0xff]  }
  0x48   :  { %912 = vmatpush2.bf16.msra.mxu0 %v3368_v54  ;;  %v3405_v54 = vld [vmem:[%s4981_s4 + $0x2c0] ss:$8 sps:$4 sm:$0xff]  }
  0x49   :  { %1010 = vmatprep.subr.bf16.mxu0 %v988_v59  ;;  %v3416_v59 = vld [vmem:[%s4981_s4 + $0x294] ss:$8 sps:$4 sm:$0xff]  }
  0x4a   :  { %865 = vmatpush2.bf16.msra.mxu1 %v3347_v40  ;;  %v3384_v40 = vld [vmem:[%s4981_s4 + $0x230] ss:$8 sps:$4 sm:$0xff]  }
  0x4b   :  { %866 = vmatprep.subr.bf16.mxu1 %v3355_v44  ;;  %v3390_v44 = vld [vmem:[%s4981_s4 + $0x210] ss:$8 sps:$4 sm:$0xff]  }
  0x4e   :  { %867 = vmatpush2.bf16.msra.mxu1 %v3353_v43  ;;  %v3392_v43 = vld [vmem:[%s4981_s4 + $0x214] ss:$8 sps:$4 sm:$0xff]  }
  0x4f   :  { %868 = vmatprep.subr.bf16.mxu1 %v3361_v47  ;;  %v3398_v47 = vld [vmem:[%s4981_s4 + $0x2f4] ss:$8 sps:$4 sm:$0xff]  }
  0x52   :  { %869 = vmatpush2.bf16.msra.mxu1 %v3359_v49  ;;  %v3401_v49 = vld [vmem:[%s4981_s4 + $0x2e4] ss:$8 sps:$4 sm:$0xff]  }
  0x53   :  { %870 = vmatprep.subr.bf16.mxu1 %v3367_v51  ;;  %v3404_v51 = vld [vmem:[%s4981_s4 + $0x2d4] ss:$8 sps:$4 sm:$0xff]  }
  0x56   :  { %871 = vmatpush2.bf16.msra.mxu1 %v3365_v53  ;;  %v3407_v53 = vld [vmem:[%s4981_s4 + $0x2c4] ss:$8 sps:$4 sm:$0xff]  }
  0x57   :  { %922 = vmatprep.subr.bf16.mxu1 %v3373_v55  ;;  %v3410_v55 = vld [vmem:[%s4981_s4 + $0x2b4] ss:$8 sps:$4 sm:$0xff]  }
  0xcb   :  { %v209_v8 = vpop.f32.mrf.mxu0 }
  0xcc   :  { %v3985_v25 = vpack.c.bf16 %v209_v8, %v209_v8 }
  0xcd   :  { %v211_v9 = vpop.f32.mrf.mxu0 }
  0xce   :  { %v3991_v31 = vpack.c.bf16 %v211_v9, %v211_v9 }
  0xcf   :  { %v213_v10 = vpop.f32.mrf.mxu0 }
  0xd1   :  { %v127_v12 = vpop.f32.mrf.mxu1  ;;  %v214_v13 = vpop.f32.mrf.mxu0 }
  0xd2   :  { %v3979_v19 = vpack.c.bf16 %v127_v12, %v127_v12  ;;  %v967_v13 = vcombine.high %v965_v56, %v965_v56  ;;  %v3408_v56 = vld [vmem:[%s4981_s4 + $0x2b0] ss:$8 sps:$4 sm:$0xff]  }
  0xd3   :  { %v129_v15 = vpop.f32.mrf.mxu1 }
  0xd4   :  { %v3977_v17 = vpack.c.bf16 %v129_v15, %v129_v15  ;;  %v981_v15 = vrot.slane %v967_v13, %v3824_v14  ;;  %v3435_v13 = vld [vmem:[%s4983_s5 + $0x150] ss:$8 sps:$4 sm:$0xff]  }
  0xd5   :  { %v131_v16 = vpop.f32.mrf.mxu1 }
  0xd6   :  { %v222_v22 = vmax.bf16 %v3977_v17, %v3979_v19  ;;  %v983_v16 = vcombine.high %v981_v15, %v981_v15  ;;  %v991_v36 = vand.u32 %v981_v15, %v3820_v11  ;;  %v3440_v15 = vld [vmem:[%s4983_s5 + $0x44] ss:$8 sps:$4 sm:$0xff]  }
  0xd7   :  { %v132_v18 = vpop.f32.mrf.mxu1 }
  0xd8   :  { %v3371_v18 = vld [vmem:[%s4981_s4 + $0x270] ss:$8 sps:$4 sm:$0xff]  }
  0xd9   :  { %v168_v21 = vpop.f32.mrf.mxu1 }
  0xda   :  { %v3983_v23 = vpack.c.bf16 %v168_v21, %v168_v21  ;;  %v3376_v21 = vld [vmem:[%s4981_s4 + $0x264] ss:$8 sps:$4 sm:$0xff]  }
  0xdb   :  { %v170_v24 = vpop.f32.mrf.mxu1 }
  0xdc   :  { %v223_v26 = vmax.bf16 %v222_v22, %v3983_v23  ;;  %v3988_v27 = vpack.c.bf16 %v170_v24, %v170_v24 }
  0xdd   :  { %v172_v28 = vpop.f32.mrf.mxu1 }
  0xde   :  { %v224_v29 = vmax.bf16 %v223_v26, %v3988_v27  ;;  %v994_v26 = vand.u32 %v983_v16, %v3820_v11  ;;  %v3443_v16 = vld [vmem:[%s4983_s5 + $0x144] ss:$8 sps:$4 sm:$0xff]  }
  0xdf   :  { %v173_v30 = vpop.f32.mrf.mxu1 }
  0xe0   :  { %v225_v32 = vmax.bf16 %v224_v29, %v3985_v25  ;;  %v3379_v30 = vld [vmem:[%s4981_s4 + $0x254] ss:$8 sps:$4 sm:$0xff]  }
  0xe2   :  { %v226_v33 = vmax.bf16 %v225_v32, %v3991_v31 }
  0xe4   :  { %v227_v34 = vunpack.c.l.bf16 %v226_v33  ;;  %v3377_v33 = vld [vmem:[%s4981_s4 + $0x250] ss:$8 sps:$4 sm:$0xff]  }
  0xe6   :  { %228 = vmax.xlane.f32.xlu0 %v227_v34 }
 0x16f   :  { %v229_v60 = vpop.xlane.xlu0 %228 }
 0x170   :  { %v230_v61 = vpack.c.bf16 %v229_v60, %v229_v60  ;;  %v3414_v60 = vld [vmem:[%s4981_s4 + $0x290] ss:$8 sps:$4 sm:$0xff]  }
 0x172   :  { %v231_v62 = vsub.bf16 %v3979_v19, %v230_v61  ;;  %v232_v63 = vsub.bf16 %v3977_v17, %v230_v61  ;;  %v233_v0 = vsub.bf16 %v3983_v23, %v230_v61  ;;  %v234_v1 = vsub.bf16 %v3988_v27, %v230_v61  ;;  %v3374_v27 = vld [vmem:[%s4981_s4 + $0x260] ss:$8 sps:$4 sm:$0xff]  }
 0x173   :  { %v236_v2 = vsub.bf16 %v3991_v31, %v230_v61  ;;  %v235_v8 = vsub.bf16 %v3985_v25, %v230_v61  ;;  %v985_v23 = vand.u32 %v974_v57, %v3820_v11  ;;  %v3413_v57 = vld [vmem:[%s4981_s4 + $0x2a4] ss:$8 sps:$4 sm:$0xff]  }
 0x174   :  { %v238_v3 = vmul.bf16 1069105081, %v231_v62  ;;  %v241_v5 = vmul.bf16 1069105081, %v232_v63  ;;  %v244_v6 = vmul.bf16 1069105081, %v233_v0 }
 0x175   :  { %v247_v9 = vmul.bf16 1069105081, %v234_v1  ;;  %v253_v10 = vmul.bf16 1069105081, %v236_v2  ;;  %v250_v12 = vmul.bf16 1069105081, %v235_v8 }
 0x176   :  { %3710 = vpow.bf16 %v238_v3  ;;  %v3419_v61 = vld [vmem:[%s4981_s4 + $0x284] ss:$8 sps:$4 sm:$0xff]   ;;  %v3417_v62 = vld [vmem:[%s4981_s4 + $0x280] ss:$8 sps:$4 sm:$0xff]   ;;  %v3420_v63 = vld [vmem:[%s4983_s5 + $0x70] ss:$8 sps:$4 sm:$0xff]  }
 0x177   :  { %3712 = vpow.bf16 %v241_v5  ;;  %v3422_v0 = vld [vmem:[%s4983_s5 + $0x74] ss:$8 sps:$4 sm:$0xff]   ;;  %v3423_v1 = vld [vmem:[%s4983_s5 + $0x170] ss:$8 sps:$4 sm:$0xff]   ;;  %v3426_v3 = vld [vmem:[%s4983_s5 + $0x60] ss:$8 sps:$4 sm:$0xff]  }
 0x178   :  { %3714 = vpow.bf16 %v244_v6  ;;  %v3425_v2 = vld [vmem:[%s4983_s5 + $0x174] ss:$8 sps:$4 sm:$0xff]   ;;  %v3428_v5 = vld [vmem:[%s4983_s5 + $0x64] ss:$8 sps:$4 sm:$0xff]   ;;  %v3429_v6 = vld [vmem:[%s4983_s5 + $0x160] ss:$8 sps:$4 sm:$0xff]  }
 0x179   :  { %3716 = vpow.bf16 %v247_v9  ;;  %v3431_v8 = vld [vmem:[%s4983_s5 + $0x164] ss:$8 sps:$4 sm:$0xff]   ;;  %v3434_v9 = vld [vmem:[%s4983_s5 + $0x54] ss:$8 sps:$4 sm:$0xff]  }
 0x17a   :  { %3718 = vpow.bf16 %v253_v10  ;;  %v3432_v10 = vld [vmem:[%s4983_s5 + $0x50] ss:$8 sps:$4 sm:$0xff]  }
 0x17b   :  { %3720 = vpow.bf16 %v250_v12  ;;  %v3437_v12 = vld [vmem:[%s4983_s5 + $0x154] ss:$8 sps:$4 sm:$0xff]  }
 0x184   :  { %v3711_v17 = vpop.eup %3710 }
 0x185   :  { %v3713_v19 = vpop.eup %3712 }
 0x186   :  { %v3715_v22 = vpop.eup %3714  ;;  %872 = vmatprep.mubr.bf16.mxu1 %v3713_v19  ;;  %v255_v24 = vadd.bf16 %v3713_v19, %v3711_v17  ;;  %v3446_v19 = vld [vmem:[%s4983_s5 + $0x34] ss:$8 sps:$4 sm:$0xff]  }
 0x187   :  { %v3717_v25 = vpop.eup %3716  ;;  %873 = vmatmul.mubr.bf16.vlgmr.msra.gmra.mxu1 %v3711_v17  ;;  %v3438_v17 = vld [vmem:[%s4983_s5 + $0x40] ss:$8 sps:$4 sm:$0xff]  }
 0x188   :  { %913 = vmatprep.mubr.bf16.mxu0 %v3717_v25  ;;  %923 = vmatpush1.bf16.msra.mxu1 %v3371_v18  ;;  %v256_v28 = vadd.bf16 %v3715_v22, %v255_v24  ;;  %v4081_v29 = vpop.eup %3718  ;;  %v3441_v18 = vld [vmem:[%s4983_s5 + $0x140] ss:$8 sps:$4 sm:$0xff]   ;;  %v3452_v24 = vld [vmem:[%s4983_s5 + $0x24] ss:$8 sps:$4 sm:$0xff]  }
 0x189   :  { %914 = vmatmul.mubr.bf16.vlgmr.msra.gmra.mxu0 %v3715_v22  ;;  %924 = vmatprep.subr.bf16.mxu1 %v3376_v21  ;;  %v4087_v32 = vpop.eup %3720  ;;  %v3449_v21 = vld [vmem:[%s4983_s5 + $0x134] ss:$8 sps:$4 sm:$0xff]   ;;  %v3444_v22 = vld [vmem:[%s4983_s5 + $0x30] ss:$8 sps:$4 sm:$0xff]  }
 0x18a   :  { %954 = vmatprep.mubr.bf16.mxu1 %v4081_v29  ;;  %1011 = vmatpush1.bf16.msra.mxu0 %v985_v23  ;;  %v257_v31 = vadd.bf16 %v3717_v25, %v256_v28  ;;  %v3447_v23 = vld [vmem:[%s4983_s5 + $0x130] ss:$8 sps:$4 sm:$0xff]   ;;  %v3455_v25 = vld [vmem:[%s4983_s5 + $0x124] ss:$8 sps:$4 sm:$0xff]   ;;  %v3458_v28 = vld [vmem:[%s4983_s5 + $0x14] ss:$8 sps:$4 sm:$0xff]  }
 0x18b   :  { %1028 = vmatprep.mubr.bf16.mxu0 %v3754_v7  ;;  %1051 = vmatprep.subr.bf16.mxu0 %v994_v26  ;;  %v3450_v26 = vld [vmem:[%s4983_s5 + $0x20] ss:$8 sps:$4 sm:$0xff]  }
 0x18c   :  { %925 = vmatpush1.bf16.msra.mxu1 %v3374_v27  ;;  %v4094_v34 = vadd.bf16 %v4087_v32, %v257_v31  ;;  %v3453_v27 = vld [vmem:[%s4983_s5 + $0x120] ss:$8 sps:$4 sm:$0xff]   ;;  %v3456_v31 = vld [vmem:[%s4983_s5 + $0x10] ss:$8 sps:$4 sm:$0xff]  }
 0x18d   :  { %926 = vmatprep.subr.bf16.mxu1 %v3379_v30  ;;  %v3461_v30 = vld [vmem:[%s4983_s5 + $0x114] ss:$8 sps:$4 sm:$0xff]  }
 0x18e   :  { %v259_v37 = vadd.bf16 %v4081_v29, %v4094_v34  ;;  %v3592_v29 = vld [vmem:[%s4985_s6 + $0xb4] ss:$8 sps:$4 sm:$0xff]  }
 0x18f   :  { %v3595_v34 = vld [vmem:[%s4985_s6 + $0x1b4] ss:$8 sps:$4 sm:$0xff]  }
 0x190   :  { %927 = vmatpush1.bf16.msra.mxu1 %v3377_v33  ;;  %v3464_v33 = vld [vmem:[%s4983_s5 + $0x4] ss:$8 sps:$4 sm:$0xff]  }
 0x191   :  { %3037 = vmatmul.mubr.msk.bf16.vlgmr.msra.gmra.mxu0 %vm67_vm2, %v3832_v20  ;;  %928 = vmatprep.subr.bf16.mxu1 %v3383_v35  ;;  %v3467_v35 = vld [vmem:[%s4983_s5 + $0x104] ss:$8 sps:$4 sm:$0xff]  }
 0x192   :  { %1052 = vmatpush1.bf16.msra.mxu0 %v991_v36  ;;  %1069 = vmatprep.mubr.bf16.mxu0 %v3754_v7  ;;  %v3462_v36 = vld [vmem:[%s4983_s5] ss:$8 sps:$4 sm:$0xff]  }
 0x193   :  { %1496 = vmatprep.subr.bf16.mxu0 %v3422_v0 }
 0x194   :  { %929 = vmatpush1.bf16.msra.mxu1 %v3381_v38  ;;  %v3465_v38 = vld [vmem:[%s4983_s5 + $0x100] ss:$8 sps:$4 sm:$0xff]  }
 0x195   :  { %930 = vmatprep.subr.bf16.mxu1 %v3386_v39  ;;  %v3470_v39 = vld [vmem:[%s4983_s5 + $0xf4] ss:$8 sps:$4 sm:$0xff]  }
 0x198   :  { %931 = vmatpush1.bf16.msra.mxu1 %v3384_v40  ;;  %v3473_v40 = vld [vmem:[%s4983_s5 + $0x1f4] ss:$8 sps:$4 sm:$0xff]  }
 0x199   :  { %3038 = vmatmul.mubr.msk.bf16.vlgmr.msra.gmra.mxu0 %vm67_vm2, %v3832_v20  ;;  %932 = vmatprep.subr.bf16.mxu1 %v3389_v41  ;;  %v3468_v41 = vld [vmem:[%s4983_s5 + $0xf0] ss:$8 sps:$4 sm:$0xff]  }
 0x19a   :  { %1497 = vmatpush1.bf16.msra.mxu0 %v3420_v63 }
 0x19b   :  { %1498 = vmatprep.subr.bf16.mxu0 %v3428_v5 }
 0x19c   :  { %933 = vmatpush1.bf16.msra.mxu1 %v3387_v42  ;;  %v3471_v42 = vld [vmem:[%s4983_s5 + $0x1f0] ss:$8 sps:$4 sm:$0xff]  }
 0x19d   :  { %934 = vmatprep.subr.bf16.mxu1 %v3392_v43  ;;  %v3476_v43 = vld [vmem:[%s4983_s5 + $0xe4] ss:$8 sps:$4 sm:$0xff]  }
 0x19e   :  { %1499 = vmatpush1.bf16.msra.mxu0 %v3426_v3 }
 0x19f   :  { %1500 = vmatprep.subr.bf16.mxu0 %v3434_v9 }
 0x1a0   :  { %935 = vmatpush1.bf16.msra.mxu1 %v3390_v44  ;;  %v3479_v44 = vld [vmem:[%s4983_s5 + $0x1e4] ss:$8 sps:$4 sm:$0xff]  }
 0x1a1   :  { %936 = vmatprep.subr.bf16.mxu1 %v3395_v45  ;;  %v3474_v45 = vld [vmem:[%s4983_s5 + $0xe0] ss:$8 sps:$4 sm:$0xff]  }
 0x1a2   :  { %1501 = vmatpush1.bf16.msra.mxu0 %v3432_v10 }
 0x1a3   :  { %1502 = vmatprep.subr.bf16.mxu0 %v3440_v15 }
 0x1a4   :  { %937 = vmatpush1.bf16.msra.mxu1 %v3393_v46  ;;  %v3477_v46 = vld [vmem:[%s4983_s5 + $0x1e0] ss:$8 sps:$4 sm:$0xff]  }
 0x1a5   :  { %938 = vmatprep.subr.bf16.mxu1 %v3398_v47  ;;  %v3482_v47 = vld [vmem:[%s4983_s5 + $0xd4] ss:$8 sps:$4 sm:$0xff]  }
 0x1a6   :  { %1503 = vmatpush1.bf16.msra.mxu0 %v3438_v17  ;;  %v3488_v17 = vld [vmem:[%s4983_s5 + $0xc4] ss:$8 sps:$4 sm:$0xff]  }
 0x1a7   :  { %1504 = vmatprep.subr.bf16.mxu0 %v3446_v19  ;;  %v3486_v19 = vld [vmem:[%s4983_s5 + $0xc0] ss:$8 sps:$4 sm:$0xff]  }
 0x1a8   :  { %939 = vmatpush2.bf16.msra.mxu1 %v3396_v48  ;;  %v3485_v48 = vld [vmem:[%s4983_s5 + $0x1d4] ss:$8 sps:$4 sm:$0xff]  }
 0x1a9   :  { %940 = vmatprep.subr.bf16.mxu1 %v3401_v49  ;;  %v3480_v49 = vld [vmem:[%s4983_s5 + $0xd0] ss:$8 sps:$4 sm:$0xff]  }
 0x1aa   :  { %1505 = vmatpush1.bf16.msra.mxu0 %v3444_v22  ;;  %v3494_v22 = vld [vmem:[%s4983_s5 + $0xb4] ss:$8 sps:$4 sm:$0xff]  }
 0x1ab   :  { %1506 = vmatprep.subr.bf16.mxu0 %v3452_v24  ;;  %v3492_v24 = vld [vmem:[%s4983_s5 + $0xb0] ss:$8 sps:$4 sm:$0xff]  }
 0x1ac   :  { %941 = vmatpush2.bf16.msra.mxu1 %v3399_v50  ;;  %v3483_v50 = vld [vmem:[%s4983_s5 + $0x1d0] ss:$8 sps:$4 sm:$0xff]  }
 0x1ad   :  { %942 = vmatprep.subr.bf16.mxu1 %v3404_v51 }
 0x1ae   :  { %1507 = vmatpush1.bf16.msra.mxu0 %v3450_v26  ;;  %v3500_v26 = vld [vmem:[%s4983_s5 + $0xa4] ss:$8 sps:$4 sm:$0xff]  }
 0x1af   :  { %1508 = vmatprep.subr.bf16.mxu0 %v3458_v28  ;;  %v3501_v28 = vld [vmem:[%s4983_s5 + $0x1a0] ss:$8 sps:$4 sm:$0xff]  }
 0x1b0   :  { %943 = vmatpush2.bf16.msra.mxu1 %v3402_v52 }
 0x1b1   :  { %944 = vmatprep.subr.bf16.mxu1 %v3407_v53 }
 0x1b2   :  { %1509 = vmatpush1.bf16.msra.mxu0 %v3456_v31  ;;  %v3506_v31 = vld [vmem:[%s4983_s5 + $0x94] ss:$8 sps:$4 sm:$0xff]  }
 0x1b3   :  { %1510 = vmatprep.subr.bf16.mxu0 %v3464_v33  ;;  %v3504_v33 = vld [vmem:[%s4983_s5 + $0x90] ss:$8 sps:$4 sm:$0xff]  }
 0x1b4   :  { %945 = vmatpush2.bf16.msra.mxu1 %v3405_v54 }
 0x1b5   :  { %946 = vmatprep.subr.bf16.mxu1 %v3410_v55 }
 0x1b6   :  { %1511 = vmatpush1.bf16.msra.mxu0 %v3462_v36  ;;  %v3512_v36 = vld [vmem:[%s4983_s5 + $0x84] ss:$8 sps:$4 sm:$0xff]  }
 0x1b7   :  { %1512 = vmatprep.subr.bf16.mxu0 %v3470_v39  ;;  %v3510_v39 = vld [vmem:[%s4983_s5 + $0x80] ss:$8 sps:$4 sm:$0xff]  }
 0x1b8   :  { %947 = vmatpush2.bf16.msra.mxu1 %v3408_v56 }
 0x1b9   :  { %948 = vmatprep.subr.bf16.mxu1 %v3413_v57 }
 0x1ba   :  { %1513 = vmatpush2.bf16.msra.mxu0 %v3468_v41  ;;  %v1582_v41 = vld [vmem:[%s4984_s3] sm:$0xff] }
 0x1bb   :  { %1514 = vmatprep.subr.bf16.mxu0 %v3476_v43 }
 0x1bc   :  { %949 = vmatpush2.bf16.msra.mxu1 %v3411_v58 }
 0x1bd   :  { %950 = vmatprep.subr.bf16.mxu1 %v3416_v59 }
 0x1be   :  { %1515 = vmatpush2.bf16.msra.mxu0 %v3474_v45 }
 0x1bf   :  { %1516 = vmatprep.subr.bf16.mxu0 %v3482_v47 }
 0x1c0   :  { %951 = vmatpush2.bf16.msra.mxu1 %v3414_v60 }
 0x1c1   :  { %952 = vmatprep.subr.bf16.mxu1 %v3419_v61 }
 0x1c2   :  { %1517 = vmatpush2.bf16.msra.mxu0 %v3480_v49 }
 0x1c3   :  { %1518 = vmatprep.subr.bf16.mxu0 %v3488_v17 }
 0x1c4   :  { %953 = vmatpush2.bf16.msra.mxu1 %v3417_v62 }
 0x1c5   :  { %1537 = vmatprep.subr.bf16.mxu1 %v3425_v2 }
 0x1c6   :  { %1519 = vmatpush2.bf16.msra.mxu0 %v3486_v19 }
 0x1c7   :  { %955 = vmatmul.mubr.bf16.vlgmr.msra.gmra.mxu1 %v4087_v32  ;;  %v3459_v32 = vld [vmem:[%s4983_s5 + $0x110] ss:$8 sps:$4 sm:$0xff]   ;;  %1520 = vmatprep.subr.bf16.mxu0 %v3494_v22 }
 0x1c8   :  { %1538 = vmatpush1.bf16.msra.mxu1 %v3423_v1 }
 0x1c9   :  { %1539 = vmatprep.subr.bf16.mxu1 %v3431_v8 }
 0x1ca   :  { %1521 = vmatpush2.bf16.msra.mxu0 %v3492_v24 }
 0x1cb   :  { %1522 = vmatprep.subr.bf16.mxu0 %v3500_v26  ;;  %v3520_v26 = vld [vmem:[%s4985_s6 + $0x74] ss:$8 sps:$4 sm:$0xff]  }
 0x1cc   :  { %1540 = vmatpush1.bf16.msra.mxu1 %v3429_v6 }
 0x1cd   :  { %1541 = vmatprep.subr.bf16.mxu1 %v3437_v12 }
 0x1d0   :  { %1542 = vmatpush1.bf16.msra.mxu1 %v3435_v13 }
 0x1d1   :  { %1543 = vmatprep.subr.bf16.mxu1 %v3443_v16 }
 0x1d4   :  { %1544 = vmatpush1.bf16.msra.mxu1 %v3441_v18  ;;  %v3491_v18 = vld [vmem:[%s4983_s5 + $0x1c4] ss:$8 sps:$4 sm:$0xff]  }
 0x1d5   :  { %1545 = vmatprep.subr.bf16.mxu1 %v3449_v21  ;;  %v3489_v21 = vld [vmem:[%s4983_s5 + $0x1c0] ss:$8 sps:$4 sm:$0xff]  }
 0x1d8   :  { %1546 = vmatpush1.bf16.msra.mxu1 %v3447_v23  ;;  %v3497_v23 = vld [vmem:[%s4983_s5 + $0x1b4] ss:$8 sps:$4 sm:$0xff]  }
 0x1d9   :  { %1547 = vmatprep.subr.bf16.mxu1 %v3455_v25  ;;  %v3495_v25 = vld [vmem:[%s4983_s5 + $0x1b0] ss:$8 sps:$4 sm:$0xff]  }
 0x1dc   :  { %1548 = vmatpush1.bf16.msra.mxu1 %v3453_v27  ;;  %v3498_v27 = vld [vmem:[%s4983_s5 + $0xa0] ss:$8 sps:$4 sm:$0xff]  }
 0x1dd   :  { %1549 = vmatprep.subr.bf16.mxu1 %v3461_v30  ;;  %v3503_v30 = vld [vmem:[%s4983_s5 + $0x1a4] ss:$8 sps:$4 sm:$0xff]   ;;  %1523 = vmatpush2.bf16.msra.mxu0 %v3498_v27  ;;  %v3523_v27 = vld [vmem:[%s4985_s6 + $0x174] ss:$8 sps:$4 sm:$0xff]  }
 0x1de   :  { %1524 = vmatprep.subr.bf16.mxu0 %v3506_v31  ;;  %v3532_v31 = vld [vmem:[%s4985_s6 + $0x54] ss:$8 sps:$4 sm:$0xff]  }
 0x1e0   :  { %1550 = vmatpush1.bf16.msra.mxu1 %v3459_v32  ;;  %v3509_v32 = vld [vmem:[%s4983_s5 + $0x194] ss:$8 sps:$4 sm:$0xff]  }
 0x1e1   :  { %1551 = vmatprep.subr.bf16.mxu1 %v3467_v35  ;;  %v3507_v35 = vld [vmem:[%s4983_s5 + $0x190] ss:$8 sps:$4 sm:$0xff]   ;;  %1525 = vmatpush2.bf16.msra.mxu0 %v3504_v33  ;;  %v3535_v33 = vld [vmem:[%s4985_s6 + $0x154] ss:$8 sps:$4 sm:$0xff]  }
 0x1e2   :  { %1526 = vmatprep.subr.bf16.mxu0 %v3512_v36  ;;  %v3538_v36 = vld [vmem:[%s4985_s6 + $0x44] ss:$8 sps:$4 sm:$0xff]  }
 0x1e4   :  { %1552 = vmatpush1.bf16.msra.mxu1 %v3465_v38  ;;  %v3515_v38 = vld [vmem:[%s4983_s5 + $0x184] ss:$8 sps:$4 sm:$0xff]  }
 0x1e5   :  { %1553 = vmatprep.subr.bf16.mxu1 %v3473_v40  ;;  %v3513_v40 = vld [vmem:[%s4983_s5 + $0x180] ss:$8 sps:$4 sm:$0xff]   ;;  %1527 = vmatpush2.bf16.msra.mxu0 %v3510_v39 }
 0x1e6   :  { %v3536_v39 = vld [vmem:[%s4985_s6 + $0x40] ss:$8 sps:$4 sm:$0xff]  }
 0x1e8   :  { %1554 = vmatpush2.bf16.msra.mxu1 %v3471_v42  ;;  %v1593_v42 = vrot.slane %v1582_v41, %v3824_v14 }
 0x1e9   :  { %1555 = vmatprep.subr.bf16.mxu1 %v3479_v44 }
 0x1ea   :  { %v1601_v43 = vcombine.high %v1593_v42, %v1593_v42 }
 0x1ec   :  { %1556 = vmatpush2.bf16.msra.mxu1 %v3477_v46  ;;  %v1624_v45 = vand.u32 %v1601_v43, %v3820_v11  ;;  %v3542_v43 = vld [vmem:[%s4985_s6 + $0x30] ss:$8 sps:$4 sm:$0xff]  }
 0x1ed   :  { %1557 = vmatprep.subr.bf16.mxu1 %v3485_v48 }
 0x1ee   :  { %1658 = vmatprep.subr.bf16.mxu0 %v1624_v45  ;;  %v3550_v45 = vld [vmem:[%s4985_s6 + $0x24] ss:$8 sps:$4 sm:$0xff]  }
 0x1f0   :  { %1558 = vmatpush2.bf16.msra.mxu1 %v3483_v50 }
 0x1f1   :  { %1559 = vmatprep.subr.bf16.mxu1 %v3491_v18 }
 0x1f4   :  { %1560 = vmatpush2.bf16.msra.mxu1 %v3489_v21 }
 0x1f5   :  { %1561 = vmatprep.subr.bf16.mxu1 %v3497_v23 }
 0x1f8   :  { %1562 = vmatpush2.bf16.msra.mxu1 %v3495_v25  ;;  %v3518_v25 = vld [vmem:[%s4985_s6 + $0x70] ss:$8 sps:$4 sm:$0xff]  }
 0x1f9   :  { %1563 = vmatprep.subr.bf16.mxu1 %v3503_v30  ;;  %v3529_v30 = vld [vmem:[%s4985_s6 + $0x164] ss:$8 sps:$4 sm:$0xff]  }
 0x1fc   :  { %1564 = vmatpush2.bf16.msra.mxu1 %v3501_v28  ;;  %v3527_v28 = vld [vmem:[%s4985_s6 + $0x160] ss:$8 sps:$4 sm:$0xff]  }
 0x1fd   :  { %1565 = vmatprep.subr.bf16.mxu1 %v3509_v32  ;;  %v3530_v32 = vld [vmem:[%s4985_s6 + $0x50] ss:$8 sps:$4 sm:$0xff]  }
 0x200   :  { %1566 = vmatpush2.bf16.msra.mxu1 %v3507_v35  ;;  %v3533_v35 = vld [vmem:[%s4985_s6 + $0x150] ss:$8 sps:$4 sm:$0xff]  }
 0x201   :  { %1567 = vmatprep.subr.bf16.mxu1 %v3515_v38  ;;  %v3541_v38 = vld [vmem:[%s4985_s6 + $0x144] ss:$8 sps:$4 sm:$0xff]  }
 0x204   :  { %1568 = vmatpush2.bf16.msra.mxu1 %v3513_v40  ;;  %v3539_v40 = vld [vmem:[%s4985_s6 + $0x140] ss:$8 sps:$4 sm:$0xff]  }
 0x205   :  { %2679 = vmatprep.subr.bf16.mxu1 %v3523_v27 }
 0x247   :  { %v874_v51 = vpop.f32.mrf.mxu1 }
 0x249   :  { %v915_v52 = vpop.f32.mrf.mxu0  ;;  %v876_v53 = vpop.f32.mrf.mxu1 }
 0x24a   :  { %v4315_v54 = vadd.f32 %v915_v52, %v874_v51 }
 0x24b   :  { %v917_v55 = vpop.f32.mrf.mxu0  ;;  %v878_v56 = vpop.f32.mrf.mxu1 }
 0x24c   :  { %v4317_v57 = vadd.f32 %v917_v55, %v876_v53 }
 0x24d   :  { %v919_v58 = vpop.f32.mrf.mxu0  ;;  %v879_v59 = vpop.f32.mrf.mxu1 }
 0x24f   :  { %v920_v60 = vpop.f32.mrf.mxu0 }
 0x251   :  { %v1030_v61 = vpop.f32.mrf.mxu0 }
 0x252   :  { %v4321_v2 = vpack.c.bf16 %v1030_v61, %v1030_v61 }
 0x253   :  { %v1032_v62 = vpop.f32.mrf.mxu0 }
 0x254   :  { %v4319_v0 = vpack.c.bf16 %v1032_v62, %v1032_v62 }
 0x255   :  { %v1034_v63 = vpop.f32.mrf.mxu0 }
 0x256   :  { %v1082_v5 = vmax.bf16 %v4319_v0, %v4321_v2 }
 0x257   :  { %v1035_v1 = vpop.f32.mrf.mxu0 }
 0x259   :  { %v1071_v3 = vpop.f32.mrf.mxu0 }
 0x25a   :  { %v4325_v6 = vpack.c.bf16 %v1071_v3, %v1071_v3 }
 0x25b   :  { %v1073_v8 = vpop.f32.mrf.mxu0 }
 0x25c   :  { %v1083_v9 = vmax.bf16 %v1082_v5, %v4325_v6  ;;  %v4328_v10 = vpack.c.bf16 %v1073_v8, %v1073_v8 }
 0x25d   :  { %v1075_v12 = vpop.f32.mrf.mxu0 }
 0x25e   :  { %v1084_v13 = vmax.bf16 %v1083_v9, %v4328_v10 }
 0x25f   :  { %v1076_v15 = vpop.f32.mrf.mxu0 }
 0x260   :  { %v1085_v16 = vunpack.c.l.bf16 %v1084_v13 }
 0x262   :  { %1086 = vmax.xlane.f32.xlu0 %v1085_v16 }
 0x287   :  { %v956_v44 = vpop.f32.mrf.mxu1 }
 0x288   :  { %v4397_v46 = vadd.f32 %v956_v44, %v4315_v54  ;;  %v3545_v44 = vld [vmem:[%s4985_s6 + $0x130] ss:$8 sps:$4 sm:$0xff]  }
 0x289   :  { %v958_v47 = vpop.f32.mrf.mxu1 }
 0x28a   :  { %v4400_v48 = vadd.f32 %v958_v47, %v4317_v57  ;;  %v1586_v57 = vcombine.high %v1582_v41, %v1582_v41  ;;  %v3544_v41 = vld [vmem:[%s4985_s6 + $0x34] ss:$8 sps:$4 sm:$0xff]   ;;  %v3553_v47 = vld [vmem:[%s4985_s6 + $0x124] ss:$8 sps:$4 sm:$0xff]  }
 0x28b   :  { %v960_v49 = vpop.f32.mrf.mxu1 }
 0x28c   :  { %v1600_v62 = vrot.slane %v1586_v57, %v3824_v14  ;;  %v3548_v49 = vld [vmem:[%s4985_s6 + $0x20] ss:$8 sps:$4 sm:$0xff]   ;;  %v3566_v57 = vld [vmem:[%s4985_s6 + $0xf0] ss:$8 sps:$4 sm:$0xff]  }
 0x28d   :  { %v961_v50 = vpop.f32.mrf.mxu1 }
 0x28e   :  { %v1602_v63 = vcombine.high %v1600_v62, %v1600_v62  ;;  %v1627_v18 = vand.u32 %v1600_v62, %v3820_v11  ;;  %v3551_v50 = vld [vmem:[%s4985_s6 + $0x120] ss:$8 sps:$4 sm:$0xff]   ;;  %v3569_v62 = vld [vmem:[%s4985_s6 + $0x1f0] ss:$8 sps:$4 sm:$0xff]  }
 0x290   :  { %v1630_v9 = vand.u32 %v1602_v63, %v3820_v11  ;;  %v3574_v63 = vld [vmem:[%s4985_s6 + $0xe4] ss:$8 sps:$4 sm:$0xff]  }
 0x2eb   :  { %v1087_v51 = vpop.xlane.xlu0 %1086 }
 0x2ec   :  { %v1088_v52 = vpack.c.bf16 %v1087_v51, %v1087_v51  ;;  %v3556_v51 = vld [vmem:[%s4985_s6 + $0x14] ss:$8 sps:$4 sm:$0xff]  }
 0x2ee   :  { %v1089_v53 = vsub.bf16 %v4321_v2, %v1088_v52  ;;  %v1090_v55 = vsub.bf16 %v4319_v0, %v1088_v52  ;;  %v1091_v56 = vsub.bf16 %v4325_v6, %v1088_v52  ;;  %v1092_v58 = vsub.bf16 %v4328_v10, %v1088_v52  ;;  %v1583_v0 = vld [vmem:[%s4984_s3 + $0x8] sm:$0xff]  ;;  %v3559_v52 = vld [vmem:[%s4985_s6 + $0x114] ss:$8 sps:$4 sm:$0xff]  }
 0x2ef   :  { %v1621_v2 = vand.u32 %v1593_v42, %v3820_v11  ;;  %v1610_v5 = vrot.slane %v1583_v0, %v3824_v14  ;;  %v1603_v15 = vcombine.high %v1583_v0, %v1583_v0  ;;  %v3547_v42 = vld [vmem:[%s4985_s6 + $0x134] ss:$8 sps:$4 sm:$0xff]   ;;  %v3577_v0 = vld [vmem:[%s4985_s6 + $0x1e4] ss:$8 sps:$4 sm:$0xff]  }
 0x2f0   :  { %v1094_v59 = vmul.bf16 1069105081, %v1089_v53  ;;  %v1097_v54 = vmul.bf16 1069105081, %v1090_v55  ;;  %v1100_v60 = vmul.bf16 1069105081, %v1091_v56 }
 0x2f1   :  { %v1103_v61 = vmul.bf16 1069105081, %v1092_v58  ;;  %v1618_v13 = vcombine.high %v1610_v5, %v1610_v5  ;;  %v1617_v21 = vrot.slane %v1603_v15, %v3824_v14  ;;  %v1633_v23 = vand.u32 %v1610_v5, %v3820_v11  ;;  %v3554_v53 = vld [vmem:[%s4985_s6 + $0x10] ss:$8 sps:$4 sm:$0xff]   ;;  %v3562_v56 = vld [vmem:[%s4985_s6 + $0x4] ss:$8 sps:$4 sm:$0xff]  }
 0x2f2   :  { %3722 = vpow.bf16 %v1094_v59  ;;  %v3557_v55 = vld [vmem:[%s4985_s6 + $0x110] ss:$8 sps:$4 sm:$0xff]   ;;  %v3565_v58 = vld [vmem:[%s4985_s6 + $0x104] ss:$8 sps:$4 sm:$0xff]   ;;  %v3560_v59 = vld [vmem:[%s4985_s6] ss:$8 sps:$4 sm:$0xff]  }
 0x2f3   :  { %3724 = vpow.bf16 %v1097_v54  ;;  %v1636_v19 = vand.u32 %v1618_v13, %v3820_v11  ;;  %v1619_v22 = vcombine.high %v1617_v21, %v1617_v21  ;;  %v1639_v14 = vand.u32 %v1617_v21, %v3820_v11  ;;  %v3563_v54 = vld [vmem:[%s4985_s6 + $0x100] ss:$8 sps:$4 sm:$0xff]   ;;  %v3583_v5 = vld [vmem:[%s4985_s6 + $0x1d4] ss:$8 sps:$4 sm:$0xff]  }
 0x2f4   :  { %3726 = vpow.bf16 %v1100_v60  ;;  %v3568_v60 = vld [vmem:[%s4985_s6 + $0xf4] ss:$8 sps:$4 sm:$0xff]  }
 0x2f5   :  { %3728 = vpow.bf16 %v1103_v61  ;;  %v1642_v24 = vand.u32 %v1619_v22, %v3820_v11  ;;  %v3521_v11 = vld [vmem:[%s4985_s6 + $0x170] ss:$8 sps:$4 sm:$0xff]   ;;  %v3571_v61 = vld [vmem:[%s4985_s6 + $0x1f4] ss:$8 sps:$4 sm:$0xff]  }
 0x300   :  { %v3723_v1 = vpop.eup %3722 }
 0x301   :  { %v3725_v3 = vpop.eup %3724 }
 0x302   :  { %v3727_v6 = vpop.eup %3726  ;;  %1528 = vmatprep.mubr.bf16.mxu0 %v3725_v3  ;;  %v1105_v8 = vadd.bf16 %v3725_v3, %v3723_v1  ;;  %v3580_v3 = vld [vmem:[%s4985_s6 + $0xd4] ss:$8 sps:$4 sm:$0xff]  }
 0x303   :  { %v3729_v10 = vpop.eup %3728  ;;  %1529 = vmatmul.mubr.bf16.vlgmr.msra.gmra.mxu0 %v3723_v1  ;;  %v3572_v1 = vld [vmem:[%s4985_s6 + $0xe0] ss:$8 sps:$4 sm:$0xff]  }
 0x304   :  { %1569 = vmatprep.mubr.bf16.mxu1 %v3729_v10  ;;  %1659 = vmatpush1.bf16.msra.mxu0 %v1621_v2  ;;  %v1106_v12 = vadd.bf16 %v3727_v6, %v1105_v8  ;;  %v3575_v2 = vld [vmem:[%s4985_s6 + $0x1e0] ss:$8 sps:$4 sm:$0xff]   ;;  %v3581_v8 = vld [vmem:[%s4985_s6 + $0x1d0] ss:$8 sps:$4 sm:$0xff]  }
 0x305   :  { %1570 = vmatmul.mubr.bf16.vlgmr.msra.gmra.mxu1 %v3727_v6  ;;  %1676 = vmatprep.mubr.bf16.mxu0 %v3754_v7  ;;  %v3578_v6 = vld [vmem:[%s4985_s6 + $0xd0] ss:$8 sps:$4 sm:$0xff]  }
 0x306   :  { %v1107_v16 = vadd.bf16 %v3729_v10, %v1106_v12  ;;  %1699 = vmatprep.subr.bf16.mxu0 %v1630_v9  ;;  %2680 = vmatpush1.bf16.msra.mxu1 %v3521_v11 }
 0x307   :  { %2681 = vmatprep.subr.bf16.mxu1 %v3529_v30 }
 0x308   :  { %v1108_v17 = vunpack.c.l.bf16 %v1107_v16 }
 0x30a   :  { %1109 = vadd.xlane.f32.xlu0 %v1108_v17  ;;  %2682 = vmatpush1.bf16.msra.mxu1 %v3527_v28 }
 0x30b   :  { %3103 = vmatmul.mubr.msk.bf16.vlgmr.msra.gmra.mxu0 %vm67_vm2, %v3832_v20  ;;  %2683 = vmatprep.subr.bf16.mxu1 %v3535_v33 }
 0x30c   :  { %1700 = vmatpush1.bf16.msra.mxu0 %v1627_v18  ;;  %1717 = vmatprep.mubr.bf16.mxu0 %v3754_v7 }
 0x30d   :  { %1740 = vmatprep.subr.bf16.mxu0 %v1636_v19 }
 0x30e   :  { %2684 = vmatpush1.bf16.msra.mxu1 %v3533_v35 }
 0x30f   :  { %2685 = vmatprep.subr.bf16.mxu1 %v3541_v38 }
 0x312   :  { %2686 = vmatpush1.bf16.msra.mxu1 %v3539_v40 }
 0x313   :  { %3104 = vmatmul.mubr.msk.bf16.vlgmr.msra.gmra.mxu0 %vm67_vm2, %v3832_v20  ;;  %2687 = vmatprep.subr.bf16.mxu1 %v3547_v42 }
 0x314   :  { %1741 = vmatpush1.bf16.msra.mxu0 %v1633_v23  ;;  %1758 = vmatprep.mubr.bf16.mxu0 %v3754_v7 }
 0x315   :  { %1781 = vmatprep.subr.bf16.mxu0 %v1642_v24 }
 0x316   :  { %2688 = vmatpush1.bf16.msra.mxu1 %v3545_v44 }
 0x317   :  { %2689 = vmatprep.subr.bf16.mxu1 %v3553_v47 }
 0x31a   :  { %2690 = vmatpush1.bf16.msra.mxu1 %v3551_v50 }
 0x31b   :  { %3105 = vmatmul.mubr.msk.bf16.vlgmr.msra.gmra.mxu0 %vm67_vm2, %v3832_v20  ;;  %2691 = vmatprep.subr.bf16.mxu1 %v3559_v52 }
 0x31c   :  { %1782 = vmatpush1.bf16.msra.mxu0 %v1639_v14  ;;  %1799 = vmatprep.mubr.bf16.mxu0 %v3754_v7  ;;  %v3524_v7 = vld [vmem:[%s4985_s6 + $0x60] ss:$8 sps:$4 sm:$0xff]  }
 0x31d   :  { %2638 = vmatprep.subr.bf16.mxu0 %v3520_v26 }
 0x31e   :  { %2692 = vmatpush1.bf16.msra.mxu1 %v3557_v55 }
 0x31f   :  { %2693 = vmatprep.subr.bf16.mxu1 %v3565_v58  ;;  %v3586_v58 = vld [vmem:[%s4985_s6 + $0xc4] ss:$8 sps:$4 sm:$0xff]  }
 0x322   :  { %2694 = vmatpush1.bf16.msra.mxu1 %v3563_v54  ;;  %v3584_v54 = vld [vmem:[%s4985_s6 + $0xc0] ss:$8 sps:$4 sm:$0xff]  }
 0x323   :  { %3106 = vmatmul.mubr.msk.bf16.vlgmr.msra.gmra.mxu0 %vm67_vm2, %v3832_v20  ;;  %v3526_v20 = vld [vmem:[%s4985_s6 + $0x64] ss:$8 sps:$4 sm:$0xff]   ;;  %2695 = vmatprep.subr.bf16.mxu1 %v3571_v61  ;;  %v3593_v61 = vld [vmem:[%s4985_s6 + $0x1b0] ss:$8 sps:$4 sm:$0xff]  }
 0x324   :  { %2639 = vmatpush1.bf16.msra.mxu0 %v3518_v25 }
 0x325   :  { %2640 = vmatprep.subr.bf16.mxu0 %v3526_v20 }
 0x326   :  { %2696 = vmatpush2.bf16.msra.mxu1 %v3569_v62  ;;  %v3596_v62 = vld [vmem:[%s4985_s6 + $0xa0] ss:$8 sps:$4 sm:$0xff]  }
 0x327   :  { %2697 = vmatprep.subr.bf16.mxu1 %v3577_v0  ;;  %v3601_v0 = vld [vmem:[%s4985_s6 + $0x1a4] ss:$8 sps:$4 sm:$0xff]  }
 0x328   :  { %2641 = vmatpush1.bf16.msra.mxu0 %v3524_v7 }
 0x329   :  { %2642 = vmatprep.subr.bf16.mxu0 %v3532_v31 }
 0x32a   :  { %2698 = vmatpush2.bf16.msra.mxu1 %v3575_v2  ;;  %v3607_v2 = vld [vmem:[%s4985_s6 + $0x194] ss:$8 sps:$4 sm:$0xff]  }
 0x32b   :  { %2699 = vmatprep.subr.bf16.mxu1 %v3583_v5  ;;  %v3605_v5 = vld [vmem:[%s4985_s6 + $0x190] ss:$8 sps:$4 sm:$0xff]  }
 0x32c   :  { %2643 = vmatpush1.bf16.msra.mxu0 %v3530_v32 }
 0x32d   :  { %2644 = vmatprep.subr.bf16.mxu0 %v3538_v36 }
 0x32e   :  { %2700 = vmatpush2.bf16.msra.mxu1 %v3581_v8  ;;  %v3613_v8 = vld [vmem:[%s4985_s6 + $0x184] ss:$8 sps:$4 sm:$0xff]  }
 0x330   :  { %2645 = vmatpush1.bf16.msra.mxu0 %v3536_v39 }
 0x331   :  { %2646 = vmatprep.subr.bf16.mxu0 %v3544_v41 }
 0x334   :  { %2647 = vmatpush1.bf16.msra.mxu0 %v3542_v43 }
 0x335   :  { %2648 = vmatprep.subr.bf16.mxu0 %v3550_v45 }
 0x338   :  { %2649 = vmatpush1.bf16.msra.mxu0 %v3548_v49 }
 0x339   :  { %2650 = vmatprep.subr.bf16.mxu0 %v3556_v51 }
 0x33c   :  { %2651 = vmatpush1.bf16.msra.mxu0 %v3554_v53 }
 0x33d   :  { %2652 = vmatprep.subr.bf16.mxu0 %v3562_v56  ;;  %v260_v56 = vunpack.c.l.bf16 %v259_v37  ;;  %v3590_v37 = vld [vmem:[%s4985_s6 + $0xb0] ss:$8 sps:$4 sm:$0xff]  }
 0x340   :  { %2653 = vmatpush1.bf16.msra.mxu0 %v3560_v59  ;;  %v3589_v59 = vld [vmem:[%s4985_s6 + $0x1c4] ss:$8 sps:$4 sm:$0xff]  }
 0x341   :  { %2654 = vmatprep.subr.bf16.mxu0 %v3568_v60  ;;  %v3587_v60 = vld [vmem:[%s4985_s6 + $0x1c0] ss:$8 sps:$4 sm:$0xff]   ;;  %2701 = vmatprep.subr.bf16.mxu1 %v3589_v59  ;;  %v3628_v59 = vld [vmem:[%s4985_s6 + $0x254] ss:$8 sps:$4 sm:$0xff]  }
 0x342   :  { %2702 = vmatpush2.bf16.msra.mxu1 %v3587_v60 }
 0x343   :  { %2703 = vmatprep.subr.bf16.mxu1 %v3595_v34  ;;  %v3626_v34 = vld [vmem:[%s4985_s6 + $0x250] ss:$8 sps:$4 sm:$0xff]  }
 0x344   :  { %2655 = vmatpush2.bf16.msra.mxu0 %v3566_v57  ;;  %v3598_v57 = vld [vmem:[%s4985_s6 + $0xa4] ss:$8 sps:$4 sm:$0xff]  }
 0x345   :  { %2656 = vmatprep.subr.bf16.mxu0 %v3574_v63  ;;  %v3599_v63 = vld [vmem:[%s4985_s6 + $0x1a0] ss:$8 sps:$4 sm:$0xff]  }
 0x346   :  { %2704 = vmatpush2.bf16.msra.mxu1 %v3593_v61  ;;  %v3629_v61 = vld [vmem:[%s4985_s6 + $0x350] ss:$8 sps:$4 sm:$0xff]  }
 0x347   :  { %2705 = vmatprep.subr.bf16.mxu1 %v3601_v0 }
 0x348   :  { %2657 = vmatpush2.bf16.msra.mxu0 %v3572_v1  ;;  %v3604_v1 = vld [vmem:[%s4985_s6 + $0x94] ss:$8 sps:$4 sm:$0xff]  }
 0x349   :  { %2658 = vmatprep.subr.bf16.mxu0 %v3580_v3  ;;  %v3602_v3 = vld [vmem:[%s4985_s6 + $0x90] ss:$8 sps:$4 sm:$0xff]  }
 0x34a   :  { %2706 = vmatpush2.bf16.msra.mxu1 %v3599_v63 }
 0x34b   :  { %2707 = vmatprep.subr.bf16.mxu1 %v3607_v2 }
 0x34c   :  { %2659 = vmatpush2.bf16.msra.mxu0 %v3578_v6  ;;  %v3610_v6 = vld [vmem:[%s4985_s6 + $0x84] ss:$8 sps:$4 sm:$0xff]  }
 0x34d   :  { %2660 = vmatprep.subr.bf16.mxu0 %v3586_v58  ;;  %v3623_v58 = vld [vmem:[%s4985_s6 + $0x360] ss:$8 sps:$4 sm:$0xff]  }
 0x34e   :  { %2708 = vmatpush2.bf16.msra.mxu1 %v3605_v5  ;;  %v3640_v5 = vld [vmem:[%s4985_s6 + $0x234] ss:$8 sps:$4 sm:$0xff]  }
 0x34f   :  { %2709 = vmatprep.subr.bf16.mxu1 %v3613_v8 }
 0x350   :  { %2661 = vmatpush2.bf16.msra.mxu0 %v3584_v54  ;;  %v3631_v54 = vld [vmem:[%s4985_s6 + $0x354] ss:$8 sps:$4 sm:$0xff]  }
 0x351   :  { %2662 = vmatprep.subr.bf16.mxu0 %v3592_v29 }
 0x354   :  { %2663 = vmatpush2.bf16.msra.mxu0 %v3590_v37 }
 0x355   :  { %2664 = vmatprep.subr.bf16.mxu0 %v3598_v57  ;;  %v3634_v57 = vld [vmem:[%s4985_s6 + $0x244] ss:$8 sps:$4 sm:$0xff]  }
 0x358   :  { %2665 = vmatpush2.bf16.msra.mxu0 %v3596_v62  ;;  %v3637_v62 = vld [vmem:[%s4985_s6 + $0x344] ss:$8 sps:$4 sm:$0xff]  }
 0x359   :  { %2666 = vmatprep.subr.bf16.mxu0 %v3604_v1  ;;  %v3632_v1 = vld [vmem:[%s4985_s6 + $0x240] ss:$8 sps:$4 sm:$0xff]  }
 0x35c   :  { %2667 = vmatpush2.bf16.msra.mxu0 %v3602_v3  ;;  %v3635_v3 = vld [vmem:[%s4985_s6 + $0x340] ss:$8 sps:$4 sm:$0xff]  }
 0x35d   :  { %2668 = vmatprep.subr.bf16.mxu0 %v3610_v6  ;;  %v3643_v6 = vld [vmem:[%s4985_s6 + $0x334] ss:$8 sps:$4 sm:$0xff]  }
 0x3c3   :  { %v1530_v9 = vpop.f32.mrf.mxu0 }
 0x3c5   :  { %v1571_v10 = vpop.f32.mrf.mxu1  ;;  %v1532_v12 = vpop.f32.mrf.mxu0 }
 0x3c6   :  { %v4563_v13 = vadd.f32 %v1571_v10, %v1530_v9  ;;  %v3608_v9 = vld [vmem:[%s4985_s6 + $0x80] ss:$8 sps:$4 sm:$0xff]  }
 0x3c7   :  { %v1573_v15 = vpop.f32.mrf.mxu1  ;;  %v1534_v16 = vpop.f32.mrf.mxu0  ;;  %v3611_v10 = vld [vmem:[%s4985_s6 + $0x180] ss:$8 sps:$4 sm:$0xff]   ;;  %2669 = vmatpush2.bf16.msra.mxu0 %v3608_v9  ;;  %v3638_v9 = vld [vmem:[%s4985_s6 + $0x230] ss:$8 sps:$4 sm:$0xff]  }
 0x3c8   :  { %v4565_v17 = vadd.f32 %v1573_v15, %v1532_v12  ;;  %2710 = vmatpush2.bf16.msra.mxu1 %v3611_v10  ;;  %v3616_v12 = vld [vmem:[%s4985_s6 + $0x274] ss:$8 sps:$4 sm:$0xff]  }
 0x3c9   :  { %v1575_v18 = vpop.f32.mrf.mxu1  ;;  %v1535_v19 = vpop.f32.mrf.mxu0  ;;  %v3619_v15 = vld [vmem:[%s4985_s6 + $0x374] ss:$8 sps:$4 sm:$0xff]   ;;  %2720 = vmatprep.subr.bf16.mxu0 %v3616_v12  ;;  %v3641_v12 = vld [vmem:[%s4985_s6 + $0x330] ss:$8 sps:$4 sm:$0xff]  }
 0x3ca   :  { %2761 = vmatprep.subr.bf16.mxu1 %v3619_v15  ;;  %v1110_v18 = vpop.xlane.xlu0 %1109  ;;  %v3646_v15 = vld [vmem:[%s4985_s6 + $0x224] ss:$8 sps:$4 sm:$0xff]  }
 0x3cb   :  { %v1576_v21 = vpop.f32.mrf.mxu1  ;;  %v1678_v22 = vpop.f32.mrf.mxu0  ;;  %3730 = vrcp.f32 %v1110_v18  ;;  %v3644_v18 = vld [vmem:[%s4985_s6 + $0x220] ss:$8 sps:$4 sm:$0xff]  }
 0x3cc   :  { %v4569_v27 = vpack.c.bf16 %v1678_v22, %v1678_v22 }
 0x3cd   :  { %v1680_v23 = vpop.f32.mrf.mxu0 }
 0x3ce   :  { %v4567_v26 = vpack.c.bf16 %v1680_v23, %v1680_v23 }
 0x3cf   :  { %v1682_v24 = vpop.f32.mrf.mxu0 }
 0x3d0   :  { %v1816_v28 = vmax.bf16 %v4567_v26, %v4569_v27 }
 0x3d1   :  { %v1683_v14 = vpop.f32.mrf.mxu0 }
 0x3d3   :  { %v1719_v25 = vpop.f32.mrf.mxu0 }
 0x3d4   :  { %v4571_v7 = vpack.c.bf16 %v1719_v25, %v1719_v25 }
 0x3d5   :  { %v1721_v11 = vpop.f32.mrf.mxu0 }
 0x3d6   :  { %v1817_v31 = vmax.bf16 %v1816_v28, %v4571_v7  ;;  %v4576_v32 = vpack.c.bf16 %v1721_v11, %v1721_v11 }
 0x3d7   :  { %v1723_v20 = vpop.f32.mrf.mxu0 }
 0x3d8   :  { %v1818_v38 = vmax.bf16 %v1817_v31, %v4576_v32 }
 0x3d9   :  { %v1724_v30 = vpop.f32.mrf.mxu0 }
 0x3db   :  { %v1760_v33 = vpop.f32.mrf.mxu0 }
 0x3dc   :  { %v4578_v35 = vpack.c.bf16 %v1760_v33, %v1760_v33 }
 0x3dd   :  { %v1762_v36 = vpop.f32.mrf.mxu0 }
 0x3de   :  { %v1819_v40 = vmax.bf16 %v1818_v38, %v4578_v35  ;;  %v4582_v41 = vpack.c.bf16 %v1762_v36, %v1762_v36  ;;  %v3731_v38 = vpop.eup %3730 }
 0x3df   :  { %v1764_v39 = vpop.f32.mrf.mxu0 }
 0x3e0   :  { %v1820_v44 = vmax.bf16 %v1819_v40, %v4582_v41  ;;  %v1578_v40 = vmul.f32 %v3731_v38, %v4563_v13  ;;  %v3617_v13 = vld [vmem:[%s4985_s6 + $0x370] ss:$8 sps:$4 sm:$0xff]  }
 0x3e1   :  { %v1765_v42 = vpop.f32.mrf.mxu0 }
 0x3e3   :  { %v1801_v43 = vpop.f32.mrf.mxu0 }
 0x3e4   :  { %v4585_v45 = vpack.c.bf16 %v1801_v43, %v1801_v43 }
 0x3e5   :  { %v1803_v47 = vpop.f32.mrf.mxu0 }
 0x3e6   :  { %v4587_v49 = vpack.c.bf16 %v1803_v47, %v1803_v47  ;;  %v1821_v50 = vmax.bf16 %v1820_v44, %v4585_v45 }
 0x3e7   :  { %v1805_v51 = vpop.f32.mrf.mxu0 }
 0x3e8   :  { %v1822_v52 = vmax.bf16 %v1821_v50, %v4587_v49  ;;  %v3625_v51 = vld [vmem:[%s4985_s6 + $0x364] ss:$8 sps:$4 sm:$0xff]  }
 0x3e9   :  { %v1806_v53 = vpop.f32.mrf.mxu0 }
 0x3ea   :  { %v1823_v55 = vunpack.c.l.bf16 %v1822_v52  ;;  %v3620_v53 = vld [vmem:[%s4985_s6 + $0x260] ss:$8 sps:$4 sm:$0xff]  }
 0x3ec   :  { %1824 = vmax.xlane.f32.xlu1 %v1823_v55 }
 0x3f0   :  { %261 = vadd.xlane.f32.xlu1 %v260_v56 }
 0x475   :  { %v1825_v16 = vpop.xlane.xlu1 %1824 }
 0x476   :  { %v1826_v19 = vpack.c.bf16 %v1825_v16, %v1825_v16  ;;  %v3649_v16 = vld [vmem:[%s4985_s6 + $0x324] ss:$8 sps:$4 sm:$0xff]  }
 0x478   :  { %v1827_v21 = vsub.bf16 %v4569_v27, %v1826_v19  ;;  %v1828_v22 = vsub.bf16 %v4567_v26, %v1826_v19  ;;  %v1829_v23 = vsub.bf16 %v4571_v7, %v1826_v19  ;;  %v1830_v24 = vsub.bf16 %v4576_v32, %v1826_v19 }
 0x479   :  { %v1832_v14 = vsub.bf16 %v4582_v41, %v1826_v19  ;;  %v1834_v25 = vsub.bf16 %v4587_v49, %v1826_v19  ;;  %v262_v11 = vpop.xlane.xlu1 %261  ;;  %v1831_v27 = vsub.bf16 %v4578_v35, %v1826_v19  ;;  %v1833_v7 = vsub.bf16 %v4585_v45, %v1826_v19  ;;  %v3614_v49 = vld [vmem:[%s4985_s6 + $0x270] ss:$8 sps:$4 sm:$0xff]   ;;  %v3647_v19 = vld [vmem:[%s4985_s6 + $0x320] ss:$8 sps:$4 sm:$0xff]  }
 0x47a   :  { %v1836_v20 = vmul.bf16 1069105081, %v1827_v21  ;;  %v1839_v28 = vmul.bf16 1069105081, %v1828_v22  ;;  %v1842_v30 = vmul.bf16 1069105081, %v1829_v23  ;;  %3732 = vrcp.f32 %v262_v11 }
 0x47b   :  { %v1845_v31 = vmul.bf16 1069105081, %v1830_v24  ;;  %v1851_v26 = vmul.bf16 1069105081, %v1832_v14  ;;  %v1857_v33 = vmul.bf16 1069105081, %v1834_v25  ;;  %v1579_v41 = vmul.f32 %v3731_v38, %v4565_v17 }
 0x47c   :  { %3734 = vpow.bf16 %v1836_v20  ;;  %v1848_v32 = vmul.bf16 1069105081, %v1831_v27  ;;  %v1854_v36 = vmul.bf16 1069105081, %v1833_v7  ;;  %v3652_v21 = vld [vmem:[%s4985_s6 + $0x214] ss:$8 sps:$4 sm:$0xff]  }
 0x47d   :  { %3736 = vpow.bf16 %v1842_v30  ;;  %v3655_v22 = vld [vmem:[%s4985_s6 + $0x314] ss:$8 sps:$4 sm:$0xff]   ;;  %v3650_v23 = vld [vmem:[%s4985_s6 + $0x210] ss:$8 sps:$4 sm:$0xff]   ;;  %v3658_v14 = vld [vmem:[%s4985_s6 + $0x204] ss:$8 sps:$4 sm:$0xff]  }
 0x47e   :  { %3738 = vpow.bf16 %v1839_v28  ;;  %v3653_v24 = vld [vmem:[%s4985_s6 + $0x310] ss:$8 sps:$4 sm:$0xff]   ;;  %v3661_v25 = vld [vmem:[%s4985_s6 + $0x304] ss:$8 sps:$4 sm:$0xff]   ;;  %v3656_v11 = vld [vmem:[%s4985_s6 + $0x200] ss:$8 sps:$4 sm:$0xff]  }
 0x47f   :  { %3740 = vpow.bf16 %v1845_v31  ;;  %v3659_v20 = vld [vmem:[%s4985_s6 + $0x300] ss:$8 sps:$4 sm:$0xff]   ;;  %v3664_v28 = vld [vmem:[%s4985_s6 + $0x2f4] ss:$8 sps:$4 sm:$0xff]   ;;  %v3662_v31 = vld [vmem:[%s4985_s6 + $0x2f0] ss:$8 sps:$4 sm:$0xff]  }
 0x480   :  { %3742 = vpow.bf16 %v1851_v26  ;;  %v3667_v30 = vld [vmem:[%s4985_s6 + $0x3f4] ss:$8 sps:$4 sm:$0xff]   ;;  %v3665_v27 = vld [vmem:[%s4985_s6 + $0x3f0] ss:$8 sps:$4 sm:$0xff]   ;;  %v3670_v26 = vld [vmem:[%s4985_s6 + $0x2e4] ss:$8 sps:$4 sm:$0xff]  }
 0x481   :  { %3744 = vpow.bf16 %v1857_v33  ;;  %v3673_v33 = vld [vmem:[%s4985_s6 + $0x3e4] ss:$8 sps:$4 sm:$0xff]   ;;  %v3668_v7 = vld [vmem:[%s4985_s6 + $0x2e0] ss:$8 sps:$4 sm:$0xff]   ;;  %v3679_v38 = vld [vmem:[%s4985_s6 + $0x3d4] ss:$8 sps:$4 sm:$0xff]  }
 0x482   :  { %3746 = vpow.bf16 %v1848_v32  ;;  %v3671_v32 = vld [vmem:[%s4985_s6 + $0x3e0] ss:$8 sps:$4 sm:$0xff]  }
 0x483   :  { %3748 = vpow.bf16 %v1854_v36  ;;  %v3676_v36 = vld [vmem:[%s4985_s6 + $0x2d4] ss:$8 sps:$4 sm:$0xff]  }
 0x487   :  { %v3733_v39 = vpop.eup %3732 }
 0x488   :  { %v963_v35 = vmul.f32 %v3733_v39, %v4397_v46  ;;  %v964_v42 = vmul.f32 %v3733_v39, %v4400_v48  ;;  %v3622_v46 = vld [vmem:[%s4985_s6 + $0x264] ss:$8 sps:$4 sm:$0xff]   ;;  %v3674_v39 = vld [vmem:[%s4985_s6 + $0x2d0] ss:$8 sps:$4 sm:$0xff]  }
 0x48a   :  { %v3735_v43 = vpop.eup %3734  ;;  %v4672_v44 = vadd.f32 %v1578_v40, %v963_v35  ;;  %v4674_v45 = vadd.f32 %v1579_v41, %v964_v42  ;;  %v3677_v40 = vld [vmem:[%s4985_s6 + $0x3d0] ss:$8 sps:$4 sm:$0xff]   ;;  %v3682_v41 = vld [vmem:[%s4985_s6 + $0x2c4] ss:$8 sps:$4 sm:$0xff]   ;;  %v3680_v42 = vld [vmem:[%s4985_s6 + $0x2c0] ss:$8 sps:$4 sm:$0xff]  }
 0x48b   :  { %v3737_v47 = vpop.eup %3736  ;;  %v3685_v35 = vld [vmem:[%s4985_s6 + $0x3c4] ss:$8 sps:$4 sm:$0xff]  }
 0x48c   :  { %v3739_v50 = vpop.eup %3738 }
 0x48d   :  { %v3741_v17 = vpop.eup %3740  ;;  %2670 = vmatprep.mubr.bf16.mxu0 %v3739_v50  ;;  %v1859_v48 = vadd.bf16 %v3739_v50, %v3735_v43  ;;  %v3686_v50 = vld [vmem:[%s4985_s6 + $0x2b0] ss:$8 sps:$4 sm:$0xff]  }
 0x48e   :  { %2711 = vmatprep.mubr.bf16.mxu1 %v3741_v17  ;;  %2671 = vmatmul.mubr.bf16.vlgmr.msra.gmra.mxu0 %v3735_v43  ;;  %v3743_v52 = vpop.eup %3742  ;;  %v3683_v43 = vld [vmem:[%s4985_s6 + $0x3c0] ss:$8 sps:$4 sm:$0xff]  }
 0x48f   :  { %2712 = vmatmul.mubr.bf16.vlgmr.msra.gmra.mxu1 %v3737_v47  ;;  %2721 = vmatpush1.bf16.msra.mxu0 %v3614_v49  ;;  %v1860_v55 = vadd.bf16 %v3737_v47, %v1859_v48  ;;  %v3745_v56 = vpop.eup %3744  ;;  %v3688_v47 = vld [vmem:[%s4985_s6 + $0x2b4] ss:$8 sps:$4 sm:$0xff]   ;;  %v3692_v48 = vld [vmem:[%s4985_s6 + $0x2a0] ss:$8 sps:$4 sm:$0xff]  }
 0x490   :  { %2762 = vmatpush1.bf16.msra.mxu1 %v3617_v13  ;;  %2752 = vmatprep.mubr.bf16.mxu0 %v3743_v52  ;;  %v4700_v29 = vpop.eup %3746  ;;  %v3691_v49 = vld [vmem:[%s4985_s6 + $0x3b4] ss:$8 sps:$4 sm:$0xff]   ;;  %v3689_v13 = vld [vmem:[%s4985_s6 + $0x3b0] ss:$8 sps:$4 sm:$0xff]  }
 0x491   :  { %2793 = vmatprep.mubr.bf16.mxu1 %v3745_v56  ;;  %2722 = vmatprep.subr.bf16.mxu0 %v3622_v46  ;;  %v1861_v60 = vadd.bf16 %v3741_v17, %v1860_v55  ;;  %v4715_v0 = vpop.eup %3748  ;;  %v3694_v17 = vld [vmem:[%s4985_s6 + $0x2a4] ss:$8 sps:$4 sm:$0xff]   ;;  %v3698_v55 = vld [vmem:[%s4985_s6 + $0x290] ss:$8 sps:$4 sm:$0xff]  }
 0x492   :  { %2763 = vmatprep.subr.bf16.mxu1 %v3625_v51  ;;  %v3697_v46 = vld [vmem:[%s4985_s6 + $0x3a4] ss:$8 sps:$4 sm:$0xff]   ;;  %v3695_v51 = vld [vmem:[%s4985_s6 + $0x3a0] ss:$8 sps:$4 sm:$0xff]  }
 0x493   :  { %2723 = vmatpush1.bf16.msra.mxu0 %v3620_v53  ;;  %v1862_v37 = vadd.bf16 %v4700_v29, %v1861_v60  ;;  %v3703_v53 = vld [vmem:[%s4985_s6 + $0x394] ss:$8 sps:$4 sm:$0xff]   ;;  %v3707_v60 = vld [vmem:[%s4985_s6 + $0x380] ss:$8 sps:$4 sm:$0xff]  }
 0x494   :  { %2764 = vmatpush1.bf16.msra.mxu1 %v3623_v58  ;;  %2724 = vmatprep.subr.bf16.mxu0 %v3628_v59  ;;  %v3706_v58 = vld [vmem:[%s4985_s6 + $0x284] ss:$8 sps:$4 sm:$0xff]  }
 0x495   :  { %2765 = vmatprep.subr.bf16.mxu1 %v3631_v54  ;;  %v1863_v63 = vadd.bf16 %v3743_v52, %v1862_v37  ;;  %v3700_v52 = vld [vmem:[%s4985_s6 + $0x294] ss:$8 sps:$4 sm:$0xff]   ;;  %v3709_v59 = vld [vmem:[%s4985_s6 + $0x384] ss:$8 sps:$4 sm:$0xff]   ;;  %v3704_v54 = vld [vmem:[%s4985_s6 + $0x280] ss:$8 sps:$4 sm:$0xff]  }
 0x496   :  { %v2837_v37 = vld [vmem:[%s4986_s8 + $0x78] sm:$0xff] }
 0x497   :  { %2725 = vmatpush1.bf16.msra.mxu0 %v3626_v34  ;;  %v1864_v2 = vadd.bf16 %v4715_v0, %v1863_v63  ;;  %v2853_v34 = vld [vmem:[%s4986_s8 + $0xf8] sm:$0xff]  ;;  %v2850_v63 = vld [vmem:[%s4986_s8 + $0xe0] sm:$0xff] }
 0x498   :  { %2766 = vmatpush1.bf16.msra.mxu1 %v3629_v61  ;;  %2726 = vmatprep.subr.bf16.mxu0 %v3634_v57  ;;  %v2852_v61 = vld [vmem:[%s4986_s8 + $0xf0] sm:$0xff] }
 0x499   :  { %2767 = vmatprep.subr.bf16.mxu1 %v3637_v62  ;;  %v1865_v8 = vadd.bf16 %v3745_v56, %v1864_v2  ;;  %v3701_v56 = vld [vmem:[%s4985_s6 + $0x390] ss:$8 sps:$4 sm:$0xff]   ;;  %v2835_v62 = vld [vmem:[%s4986_s8 + $0x68] sm:$0xff] }
 0x49a   :  { %v2836_v57 = vld [vmem:[%s4986_s8 + $0x70] sm:$0xff]  ;;  %v2833_v2 = vld [vmem:[%s4986_s8 + $0x58] sm:$0xff] }
 0x49b   :  { %2727 = vmatpush1.bf16.msra.mxu0 %v3632_v1  ;;  %v1866_v10 = vunpack.c.l.bf16 %v1865_v8  ;;  %v2849_v1 = vld [vmem:[%s4986_s8 + $0xd8] sm:$0xff]  ;;  %v2831_v8 = vld [vmem:[%s4986_s8 + $0x48] sm:$0xff] }
 0x49c   :  { %2768 = vmatpush1.bf16.msra.mxu1 %v3635_v3  ;;  %2728 = vmatprep.subr.bf16.mxu0 %v3640_v5  ;;  %v2848_v3 = vld [vmem:[%s4986_s8 + $0xd0] sm:$0xff] }
 0x49d   :  { %2769 = vmatprep.subr.bf16.mxu1 %v3643_v6  ;;  %1867 = vadd.xlane.f32.xlu1 %v1866_v10  ;;  %v2832_v5 = vld [vmem:[%s4986_s8 + $0x50] sm:$0xff]  ;;  %v2847_v6 = vld [vmem:[%s4986_s8 + $0xc8] sm:$0xff]  ;;  %v2830_v10 = vld [vmem:[%s4986_s8 + $0x40] sm:$0xff] }
 0x49f   :  { %2729 = vmatpush1.bf16.msra.mxu0 %v3638_v9  ;;  %v2846_v9 = vld [vmem:[%s4986_s8 + $0xc0] sm:$0xff] }
 0x4a0   :  { %2770 = vmatpush1.bf16.msra.mxu1 %v3641_v12  ;;  %2730 = vmatprep.subr.bf16.mxu0 %v3646_v15  ;;  %v2845_v12 = vld [vmem:[%s4986_s8 + $0xb8] sm:$0xff] }
 0x4a1   :  { %2771 = vmatprep.subr.bf16.mxu1 %v3649_v16  ;;  %v2829_v15 = vld [vmem:[%s4986_s8 + $0x38] sm:$0xff]  ;;  %v2844_v16 = vld [vmem:[%s4986_s8 + $0xb0] sm:$0xff] }
 0x4a3   :  { %2731 = vmatpush1.bf16.msra.mxu0 %v3644_v18  ;;  %v2828_v18 = vld [vmem:[%s4986_s8 + $0x30] sm:$0xff] }
 0x4a4   :  { %2772 = vmatpush1.bf16.msra.mxu1 %v3647_v19  ;;  %2732 = vmatprep.subr.bf16.mxu0 %v3652_v21  ;;  %v2843_v19 = vld [vmem:[%s4986_s8 + $0xa8] sm:$0xff] }
 0x4a5   :  { %2773 = vmatprep.subr.bf16.mxu1 %v3655_v22  ;;  %v2827_v21 = vld [vmem:[%s4986_s8 + $0x28] sm:$0xff]  ;;  %v2842_v22 = vld [vmem:[%s4986_s8 + $0xa0] sm:$0xff] }
 0x4a7   :  { %2733 = vmatpush1.bf16.msra.mxu0 %v3650_v23  ;;  %v2826_v23 = vld [vmem:[%s4986_s8 + $0x20] sm:$0xff] }
 0x4a8   :  { %2774 = vmatpush1.bf16.msra.mxu1 %v3653_v24  ;;  %2734 = vmatprep.subr.bf16.mxu0 %v3658_v14  ;;  %v2841_v24 = vld [vmem:[%s4986_s8 + $0x98] sm:$0xff] }
 0x4a9   :  { %2775 = vmatprep.subr.bf16.mxu1 %v3661_v25  ;;  %v2825_v14 = vld [vmem:[%s4986_s8 + $0x18] sm:$0xff]  ;;  %v2840_v25 = vld [vmem:[%s4986_s8 + $0x90] sm:$0xff] }
 0x4ab   :  { %2735 = vmatpush1.bf16.msra.mxu0 %v3656_v11  ;;  %v2824_v11 = vld [vmem:[%s4986_s8 + $0x10] sm:$0xff] }
 0x4ac   :  { %2776 = vmatpush1.bf16.msra.mxu1 %v3659_v20  ;;  %2736 = vmatprep.subr.bf16.mxu0 %v3664_v28  ;;  %v2839_v20 = vld [vmem:[%s4986_s8 + $0x88] sm:$0xff] }
 0x4ad   :  { %2777 = vmatprep.subr.bf16.mxu1 %v3667_v30  ;;  %v2823_v28 = vld [vmem:[%s4986_s8 + $0x8] sm:$0xff]  ;;  %v2838_v30 = vld [vmem:[%s4986_s8 + $0x80] sm:$0xff] }
 0x4af   :  { %2737 = vmatpush2.bf16.msra.mxu0 %v3662_v31  ;;  %v2822_v31 = vld [vmem:[%s4986_s8] sm:$0xff] }
 0x4b0   :  { %2778 = vmatpush2.bf16.msra.mxu1 %v3665_v27  ;;  %2738 = vmatprep.subr.bf16.mxu0 %v3670_v26 }
 0x4b1   :  { %2779 = vmatprep.subr.bf16.mxu1 %v3673_v33 }
 0x4b3   :  { %2739 = vmatpush2.bf16.msra.mxu0 %v3668_v7 }
 0x4b4   :  { %2780 = vmatpush2.bf16.msra.mxu1 %v3671_v32  ;;  %2740 = vmatprep.subr.bf16.mxu0 %v3676_v36 }
 0x4b5   :  { %2781 = vmatprep.subr.bf16.mxu1 %v3679_v38 }
 0x4b7   :  { %2741 = vmatpush2.bf16.msra.mxu0 %v3674_v39 }
 0x4b8   :  { %2782 = vmatpush2.bf16.msra.mxu1 %v3677_v40  ;;  %2742 = vmatprep.subr.bf16.mxu0 %v3682_v41 }
 0x4b9   :  { %2783 = vmatprep.subr.bf16.mxu1 %v3685_v35 }
 0x4bb   :  { %2743 = vmatpush2.bf16.msra.mxu0 %v3680_v42 }
 0x4bc   :  { %2784 = vmatpush2.bf16.msra.mxu1 %v3683_v43  ;;  %2744 = vmatprep.subr.bf16.mxu0 %v3688_v47 }
 0x4bd   :  { %2785 = vmatprep.subr.bf16.mxu1 %v3691_v49  ;;  %v2810_v49 = vsub.s32 0, %v3813_v4 }
 0x4bf   :  { %2745 = vmatpush2.bf16.msra.mxu0 %v3686_v50 }
 0x4c0   :  { %2786 = vmatpush2.bf16.msra.mxu1 %v3689_v13  ;;  %2746 = vmatprep.subr.bf16.mxu0 %v3694_v17  ;;  %v2806_v17 = vld [vmem:[%s4987_s7] sm:$0x3] }
 0x4c1   :  { %2787 = vmatprep.subr.bf16.mxu1 %v3697_v46 }
 0x4c3   :  { %2747 = vmatpush2.bf16.msra.mxu0 %v3692_v48 }
 0x4c4   :  { %2788 = vmatpush2.bf16.msra.mxu1 %v3695_v51  ;;  %2748 = vmatprep.subr.bf16.mxu0 %v3700_v52  ;;  %v2814_v51 = vsub.s32 1, %v3813_v4 }
 0x4c5   :  { %2789 = vmatprep.subr.bf16.mxu1 %v3703_v53 }
 0x4c7   :  { %2749 = vmatpush2.bf16.msra.mxu0 %v3698_v55 }
 0x4c8   :  { %2790 = vmatpush2.bf16.msra.mxu1 %v3701_v56  ;;  %2750 = vmatprep.subr.bf16.mxu0 %v3706_v58 }
 0x4c9   :  { %2791 = vmatprep.subr.bf16.mxu1 %v3709_v59  ;;  %v2811_v59 = vrot.slane %v2806_v17, %v2810_v49 }
 0x4cb   :  { %2751 = vmatpush2.bf16.msra.mxu0 %v3704_v54 }
 0x4cc   :  { %2792 = vmatpush2.bf16.msra.mxu1 %v3707_v60  ;;  %3236 = vmatprep.subr.mxu0 %v2853_v34 }
 0x4ce   :  { %2753 = vmatmul.mubr.bf16.vlgmr.msra.gmra.mxu0 %v4700_v29  ;;  %v2851_v29 = vld [vmem:[%s4986_s8 + $0xe8] sm:$0xff] }
 0x4cf   :  { %2794 = vmatmul.mubr.bf16.vlgmr.msra.gmra.mxu1 %v4715_v0  ;;  %3237 = vmatpush3.msra.mxu0 %v2837_v37  ;;  %v2834_v0 = vld [vmem:[%s4986_s8 + $0x60] sm:$0xff] }
 0x4d0   :  { %3238 = vmatprep.subr.mxu0 %v2852_v61  ;;  %v2815_v61 = vrot.slane %v2806_v17, %v2814_v51 }
 0x4d1   :  { %3239 = vmatpush3.msra.mxu0 %v2836_v57 }
 0x4d2   :  { %3240 = vmatprep.subr.mxu0 %v2851_v29 }
 0x4d3   :  { %3241 = vmatpush3.msra.mxu0 %v2835_v62 }
 0x4d4   :  { %3242 = vmatprep.subr.mxu0 %v2850_v63 }
 0x4d5   :  { %3243 = vmatpush3.msra.mxu0 %v2834_v0 }
 0x4d6   :  { %3244 = vmatprep.subr.mxu0 %v2849_v1  ;;  %v3235_v1 = vld [vmem:[%s4988_s9] ss:$0 sm:$0xff] }
 0x4d7   :  { %3245 = vmatpush3.msra.mxu0 %v2833_v2 }
 0x4d8   :  { %3246 = vmatprep.subr.mxu0 %v2848_v3 }
 0x4d9   :  { %3247 = vmatpush3.msra.mxu0 %v2832_v5 }
 0x4da   :  { %3248 = vmatprep.subr.mxu0 %v2847_v6 }
 0x4db   :  { %3249 = vmatpush3.msra.mxu0 %v2831_v8 }
 0x4dc   :  { %3250 = vmatprep.subr.mxu0 %v2846_v9 }
 0x4dd   :  { %3251 = vmatpush3.msra.mxu0 %v2830_v10 }
 0x4de   :  { %3252 = vmatprep.subr.mxu0 %v2845_v12 }
 0x4df   :  { %3253 = vmatpush3.msra.mxu0 %v2829_v15 }
 0x4e0   :  { %3254 = vmatprep.subr.mxu0 %v2844_v16 }
 0x4e1   :  { %3255 = vmatpush3.msra.mxu0 %v2828_v18 }
 0x4e2   :  { %3256 = vmatprep.subr.mxu0 %v2843_v19 }
 0x4e3   :  { %3257 = vmatpush3.msra.mxu0 %v2827_v21 }
 0x4e4   :  { %3258 = vmatprep.subr.mxu0 %v2842_v22 }
 0x4e5   :  { %3259 = vmatpush3.msra.mxu0 %v2826_v23 }
 0x4e6   :  { %3260 = vmatprep.subr.mxu0 %v2841_v24 }
 0x4e7   :  { %3261 = vmatpush3.msra.mxu0 %v2825_v14 }
 0x4e8   :  { %3262 = vmatprep.subr.mxu0 %v2840_v25 }
 0x4e9   :  { %3263 = vmatpush3.msra.mxu0 %v2824_v11 }
 0x4ea   :  { %3264 = vmatprep.subr.mxu0 %v2839_v20 }
 0x4eb   :  { %3265 = vmatpush3.msra.mxu0 %v2823_v28 }
 0x4ec   :  { %3266 = vmatprep.subr.mxu0 %v2838_v30 }
 0x4ed   :  { %3267 = vmatpush3.msra.mxu0 %v2822_v31 }
 0x526   :  { %v1868_v41 = vpop.xlane.xlu1 %1867 }
 0x527   :  { %3750 = vrcp.f32 %v1868_v41 }
 0x534   :  { %v3751_v52 = vpop.eup %3750 }
 0x54e   :  { %v2672_v27 = vpop.f32.mrf.mxu0 }
 0x54f   :  { %v2713_v26 = vpop.f32.mrf.mxu1 }
 0x550   :  { %v2714_v33 = vadd.f32 %v2713_v26, %v2672_v27  ;;  %v2674_v7 = vpop.f32.mrf.mxu0 }
 0x551   :  { %v2715_v32 = vpop.f32.mrf.mxu1 }
 0x552   :  { %v2676_v36 = vpop.f32.mrf.mxu0  ;;  %v2716_v42 = vadd.f32 %v2715_v32, %v2674_v7 }
 0x553   :  { %v2717_v38 = vpop.f32.mrf.mxu1 }
 0x554   :  { %v2677_v39 = vpop.f32.mrf.mxu0 }
 0x555   :  { %v2718_v40 = vpop.f32.mrf.mxu1 }
 0x58e   :  { %v2754_v35 = vpop.f32.mrf.mxu0 }
 0x58f   :  { %v2755_v43 = vadd.f32 %v2754_v35, %v2714_v33  ;;  %v2795_v47 = vpop.f32.mrf.mxu1 }
 0x590   :  { %v2756_v50 = vpop.f32.mrf.mxu0 }
 0x591   :  { %v2796_v13 = vadd.f32 %v2795_v47, %v2755_v43  ;;  %v2757_v46 = vadd.f32 %v2756_v50, %v2716_v42  ;;  %v2797_v48 = vpop.f32.mrf.mxu1 }
 0x592   :  { %v2758_v53 = vpop.f32.mrf.mxu0 }
 0x593   :  { %v2802_v55 = vmul.f32 %v3751_v52, %v2796_v13  ;;  %v2798_v56 = vadd.f32 %v2797_v48, %v2757_v46  ;;  %v2799_v58 = vpop.f32.mrf.mxu1 }
 0x594   :  { %v2759_v54 = vpop.f32.mrf.mxu0 }
 0x595   :  { %v2804_v60 = vadd.f32 %v2802_v55, %v4672_v44  ;;  %v2803_v34 = vmul.f32 %v3751_v52, %v2798_v56  ;;  %v2800_v37 = vpop.f32.mrf.mxu1 }
 0x597   :  { %v2805_v57 = vadd.f32 %v2803_v34, %v4674_v45  ;;  %v2818_v29 = vadd.f32 %v2811_v59, %v2804_v60 }
 0x599   :  { %v2819_v62 = vadd.f32 %v2815_v61, %v2805_v57  ;;  %v2820_v0 = vmax.f32 %v2818_v29, 0.0 }
 0x59b   :  { %v2821_v63 = vmax.f32 %v2819_v62, 0.0 }
 0x59d   :  { %2925 = vmatprep.mubr.f32.mxu0 %v2821_v63 }
 0x59e   :  { %2926 = vmatmul.mubr.f32.vlgmr.msra.gmra.mxu0 %v2820_v0 }
 0x65e   :  { %v3268_v4 = vpop.f32.mrf.mxu0 }
 0x660   :  { %v3269_v2 = vpop.f32.mrf.mxu0 }
 0x661   :  { %v3270_v3 = vadd.f32 %v3269_v2, %v3268_v4 }
 0x663   :  { %v2928_v5 = vadd.f32 %v3270_v3, %v3235_v1 }
 0x665   :  { %v2931_v44 = vpack.c.bf16 %v2928_v5, %v2928_v5 }
 0x667   :  { %2932 = vst [vmem:[%s4989_s10] sm:$0xf] %v2931_v44 }

</bundles_post_ra>
